<compile_context>
chip_gen: v7x
topology: tpu7x:2x2x1
jax: 0.10.0
libtpu: 0.0.40
codegen_flags: <defaults>
</compile_context>

<pallas_src>
import jax
import jax.numpy as jnp
from jax.experimental import pallas as pl
from jax.experimental.pallas import tpu as pltpu

WIN = 7          # SSIM window size
K1, K2 = 0.01, 0.03
ALPHA = 0.7


def _mse_ssim_kernel(x_ref, m_ref, g_ref, norm_ref, sse_ref, ssim_ref):
    # One block of B_IMG full (H, W) image pairs per grid step.
    x = x_ref[...].astype(jnp.float32)   # (B, H, W) -- network output
    m = m_ref[...].astype(jnp.float32)   # (B, H, W) -- mask
    g = g_ref[...].astype(jnp.float32)   # (B, H, W) -- ground truth
    dr = norm_ref[0]                     # scalar    -- normalizer / data_range

    B, H, W = x.shape
    OH, OW = H - WIN + 1, W - WIN + 1

    # ---- masked MSE partial sum -------------------------------------------
    d = x - g
    sse_ref[0, 0] = jnp.sum(m * d * d)

    # ---- SSIM (uniform 7x7 window, "valid" conv) ---------------------------
    X = x * m
    Y = g * m
    inv_np = 1.0 / (WIN * WIN)

    def shifted(z, k, axis):
        # shifted(z,k)[..., i, ...] = z[..., (i+k) mod size, ...]; the wrapped
        # tail is garbage and is masked out of the final reduction.
        size = z.shape[axis]
        return pltpu.roll(z, shift=(size - k) % size, axis=axis)

    def box_sum(z):
        # 7-tap box sum via log-step shift tree: 4 adds + 3 XLU rolls per axis.
        s2 = z + shifted(z, 1, 2)                               # W (lanes)
        s4 = s2 + shifted(s2, 2, 2)
        s7 = s4 + shifted(s2, 4, 2) + shifted(z, 6, 2)
        t2 = s7 + shifted(s7, 1, 1)                             # H (sublanes)
        t4 = t2 + shifted(t2, 2, 1)
        t7 = t4 + shifted(t2, 4, 1) + shifted(s7, 6, 1)
        return t7

    ux = box_sum(X) * inv_np
    uy = box_sum(Y) * inv_np
    uxx = box_sum(X * X) * inv_np
    uyy = box_sum(Y * Y) * inv_np
    uxy = box_sum(X * Y) * inv_np

    cov_norm = (WIN * WIN) / (WIN * WIN - 1.0)
    vx = cov_norm * (uxx - ux * ux)
    vy = cov_norm * (uyy - uy * uy)
    vxy = cov_norm * (uxy - ux * uy)

    c1 = (K1 * dr) ** 2
    c2 = (K2 * dr) ** 2
    a1 = 2.0 * ux * uy + c1
    a2 = 2.0 * vxy + c2
    b1 = ux * ux + uy * uy + c1
    b2 = vx + vy + c2

    # EUP approx reciprocal + one Newton step (removes ~1e-3 systematic bias).
    denom = b1 * b2
    r = pl.reciprocal(denom, approx=True)
    r = r * (2.0 - denom * r)
    s_map = (a1 * a2) * r

    # Mask the 6-pixel wrapped border once, at the reduction.
    row = jax.lax.broadcasted_iota(jnp.int32, (B, H, W), 1)
    col = jax.lax.broadcasted_iota(jnp.int32, (B, H, W), 2)
    interior = jnp.logical_and(row < OH, col < OW)
    ssim_ref[0, 0] = jnp.sum(jnp.where(interior, s_map, 0.0))


def mse_ssim_loss(output, mask, ground_truth, normalizer, alpha=ALPHA):
    """Forward pass of MSESSIMLoss.  Inputs are NCHW; returns (loss, output, gt)."""
    N, C, H, W = output.shape
    if H < WIN or W < WIN:
        raise ValueError(f"SSIM needs H,W >= {WIN}, got ({H},{W})")
    OH, OW = H - WIN + 1, W - WIN + 1
    NC = N * C

    def _prep(a):
        a = a.reshape(NC, H, W)
        if a.dtype != jnp.float32 and a.dtype != jnp.bfloat16:
            a = a.astype(jnp.float32)     # cast only when needed; bf16 stays bf16
        return a

    x = _prep(output)
    m = _prep(mask)
    g = _prep(ground_truth)
    norm = jnp.reshape(jnp.asarray(normalizer, jnp.float32), (1,))

    # ---- per-generation VMEM budget -> images per grid step ----------------
    try:
        vmem_cap = int(pltpu.get_tpu_info().vmem_capacity_bytes)
    except Exception:
        vmem_cap = 64 * 1024 * 1024       # conservative: v7x per-TensorCore VMEM
    vmem_budget = max(4 << 20, min(vmem_cap // 3, 48 << 20))
    vmem_limit = int(min(max(2 * vmem_budget, 32 << 20), (vmem_cap * 3) // 4))

    # ~28 live f32 HxW maps per image (3 inputs x 2 pipeline buffers + SSIM temps).
    per_img_bytes = 28 * H * W * 4
    b_max = int(max(1, min(NC, vmem_budget // per_img_bytes)))
    b_img = 1
    for cand in range(b_max, 0, -1):      # largest divisor of NC -> no padding pass
        if NC % cand == 0:
            b_img = cand
            break
    G = NC // b_img

    # Rough advisory cost for XLA scheduling.
    cost = pl.CostEstimate(
        flops=int(NC * 70 * H * W),
        transcendentals=int(NC * H * W),
        bytes_accessed=int(NC * H * W *
                           (x.dtype.itemsize + m.dtype.itemsize + g.dtype.itemsize)),
    )

    sse, ssim_sum = pl.pallas_call(
        _mse_ssim_kernel,
        out_shape=(jax.ShapeDtypeStruct((G, 1), jnp.float32),
                   jax.ShapeDtypeStruct((G, 1), jnp.float32)),
        grid=(G,),
        in_specs=[
            pl.BlockSpec((b_img, H, W), lambda i: (i, 0, 0)),
            pl.BlockSpec((b_img, H, W), lambda i: (i, 0, 0)),
            pl.BlockSpec((b_img, H, W), lambda i: (i, 0, 0)),
            pl.BlockSpec(memory_space=pltpu.MemorySpace.SMEM),
        ],
        out_specs=(
            pl.BlockSpec((1, 1), lambda i: (i, 0),
                         memory_space=pltpu.MemorySpace.SMEM),
            pl.BlockSpec((1, 1), lambda i: (i, 0),
                         memory_space=pltpu.MemorySpace.SMEM),
        ),
        compiler_params=pltpu.CompilerParams(
            dimension_semantics=("parallel",),   # images are independent
            vmem_limit_bytes=vmem_limit),
        cost_estimate=cost,
    )(x, m, g, norm)

    mse_loss = jnp.sum(sse) / norm[0]
    ssim_loss = 1.0 - jnp.sum(ssim_sum) / (NC * OH * OW)
    total = alpha * mse_loss + (1.0 - alpha) * ssim_loss
    return total, output, ground_truth


# ----------------------------- pure-JAX reference ----------------------------
def _reference(output, mask, ground_truth, normalizer, alpha=ALPHA):
    N, C, H, W = output.shape
    OH, OW = H - WIN + 1, W - WIN + 1
    x = output.reshape(-1, H, W).astype(jnp.float32)
    m = mask.reshape(-1, H, W).astype(jnp.float32)
    g = ground_truth.reshape(-1, H, W).astype(jnp.float32)
    dr = jnp.asarray(normalizer, jnp.float32)

    mse = jnp.sum(m * (x - g) ** 2) / dr

    def box(z):
        acc = jnp.zeros(z.shape[:-2] + (OH, OW), jnp.float32)
        for di in range(WIN):
            for dj in range(WIN):
                acc = acc + z[..., di:di + OH, dj:dj + OW]
        return acc / (WIN * WIN)

    X, Y = x * m, g * m
    ux, uy = box(X), box(Y)
    uxx, uyy, uxy = box(X * X), box(Y * Y), box(X * Y)
    cov = (WIN * WIN) / (WIN * WIN - 1.0)
    vx, vy, vxy = cov * (uxx - ux * ux), cov * (uyy - uy * uy), cov * (uxy - ux * uy)
    c1, c2 = (K1 * dr) ** 2, (K2 * dr) ** 2
    s = ((2 * ux * uy + c1) * (2 * vxy + c2)) / ((ux**2 + uy**2 + c1) * (vx + vy + c2))
    ssim = 1.0 - jnp.mean(s)
    return alpha * mse + (1.0 - alpha) * ssim


if __name__ == "__main__":
    key = jax.random.PRNGKey(0)

    def run_case(N, C, H, W, case_key):
        k1, k2, k3 = jax.random.split(case_key, 3)
        output = jax.random.normal(k1, (N, C, H, W), dtype=jnp.float32)
        ground_truth = jax.random.normal(k2, (N, C, H, W), dtype=jnp.float32)
        mask = (jax.random.uniform(k3, (N, C, H, W)) > 0.5).astype(jnp.float32)
        normalizer = jnp.maximum(jnp.sum(mask), 1.0)

        total, _, _ = mse_ssim_loss(output, mask, ground_truth, normalizer)
        jax.block_until_ready(total)

        ref = _reference(output, mask, ground_truth, normalizer)
        if not jnp.allclose(total, ref, rtol=1e-3, atol=1e-3):
            raise AssertionError(
                f"mismatch at {(N, C, H, W)}: kernel={total}, ref={ref}")

    kA, kB = jax.random.split(key)
    run_case(2, 1, 16, 16, kA)    # small square images (single-channel, as SSIM implies)
    run_case(1, 2, 24, 40, kB)    # non-square / unaligned shape, same b_img=NC path
    print("KERNEL_OK")
</pallas_src>

<mosaic_0001>
module attributes {stable_mosaic.version = 11 : i64} {
  func.func @_mse_ssim_kernel(%arg0: i32, %arg1: memref<2x16x16xf32, #tpu.memory_space<vmem>>, %arg2: memref<2x16x16xf32, #tpu.memory_space<vmem>>, %arg3: memref<2x16x16xf32, #tpu.memory_space<vmem>>, %arg4: memref<1xf32, #tpu.memory_space<smem>>, %arg5: memref<1x1xf32, #tpu.memory_space<smem>>, %arg6: memref<1x1xf32, #tpu.memory_space<smem>>) attributes {dimension_semantics = [#tpu.dimension_semantics<parallel>], iteration_bounds = array<i64: 1>, scalar_prefetch = 0 : i64, scratch_operands = 0 : i64, tpu.core_type = #tpu.core_type<tc>, window_params = [{transform_indices = @transform_0, window_bounds = array<i64: 2, 16, 16>}, {transform_indices = @transform_1, window_bounds = array<i64: 2, 16, 16>}, {transform_indices = @transform_2, window_bounds = array<i64: 2, 16, 16>}, {transform_indices = @transform_3, window_bounds = array<i64: 1>}, {transform_indices = @transform_4, window_bounds = array<i64: 1, 1>}, {transform_indices = @transform_5, window_bounds = array<i64: 1, 1>}]} {
    %c0 = arith.constant 0 : index
    %c0_0 = arith.constant 0 : index
    %c0_1 = arith.constant 0 : index
    %0 = vector.load %arg1[%c0, %c0_0, %c0_1] : memref<2x16x16xf32, #tpu.memory_space<vmem>>, vector<2x16x16xf32>
    %c0_2 = arith.constant 0 : index
    %c0_3 = arith.constant 0 : index
    %c0_4 = arith.constant 0 : index
    %1 = vector.load %arg2[%c0_2, %c0_3, %c0_4] : memref<2x16x16xf32, #tpu.memory_space<vmem>>, vector<2x16x16xf32>
    %c0_5 = arith.constant 0 : index
    %c0_6 = arith.constant 0 : index
    %c0_7 = arith.constant 0 : index
    %2 = vector.load %arg3[%c0_5, %c0_6, %c0_7] : memref<2x16x16xf32, #tpu.memory_space<vmem>>, vector<2x16x16xf32>
    %c0_8 = arith.constant 0 : index
    %3 = memref.load %arg4[%c0_8] : memref<1xf32, #tpu.memory_space<smem>>
    %4 = arith.subf %0, %2 : vector<2x16x16xf32>
    %5 = arith.mulf %1, %4 : vector<2x16x16xf32>
    %6 = arith.mulf %5, %4 : vector<2x16x16xf32>
    %7 = vector.shape_cast %6 : vector<2x16x16xf32> to vector<1x2x16x16xf32>
    %cst = arith.constant dense<0.000000e+00> : vector<1xf32>
    %8 = vector.multi_reduction <add>, %7, %cst [1, 2, 3] : vector<1x2x16x16xf32> to vector<1xf32>
    %9 = vector.shape_cast %8 : vector<1xf32> to vector<1x1x1x1xf32>
    %10 = vector.extract %9[0, 0, 0, 0] : f32 from vector<1x1x1x1xf32>
    %c0_9 = arith.constant 0 : index
    %c0_10 = arith.constant 0 : index
    %11 = memref.load %arg5[%c0_9, %c0_10] : memref<1x1xf32, #tpu.memory_space<smem>>
    memref.store %10, %arg5[%c0_9, %c0_10] : memref<1x1xf32, #tpu.memory_space<smem>>
    %12 = arith.mulf %0, %1 : vector<2x16x16xf32>
    %13 = arith.mulf %2, %1 : vector<2x16x16xf32>
    %c15_i32 = arith.constant 15 : i32
    %14 = tpu.dynamic_rotate %12 by %c15_i32 dim 2 : vector<2x16x16xf32>, i32 -> vector<2x16x16xf32>
    %15 = arith.addf %12, %14 : vector<2x16x16xf32>
    %c14_i32 = arith.constant 14 : i32
    %16 = tpu.dynamic_rotate %15 by %c14_i32 dim 2 : vector<2x16x16xf32>, i32 -> vector<2x16x16xf32>
    %17 = arith.addf %15, %16 : vector<2x16x16xf32>
    %c12_i32 = arith.constant 12 : i32
    %18 = tpu.dynamic_rotate %15 by %c12_i32 dim 2 : vector<2x16x16xf32>, i32 -> vector<2x16x16xf32>
    %19 = arith.addf %17, %18 : vector<2x16x16xf32>
    %c10_i32 = arith.constant 10 : i32
    %20 = tpu.dynamic_rotate %12 by %c10_i32 dim 2 : vector<2x16x16xf32>, i32 -> vector<2x16x16xf32>
    %21 = arith.addf %19, %20 : vector<2x16x16xf32>
    %c15_i32_11 = arith.constant 15 : i32
    %22 = tpu.dynamic_rotate %21 by %c15_i32_11 dim 1 : vector<2x16x16xf32>, i32 -> vector<2x16x16xf32>
    %23 = arith.addf %21, %22 : vector<2x16x16xf32>
    %c14_i32_12 = arith.constant 14 : i32
    %24 = tpu.dynamic_rotate %23 by %c14_i32_12 dim 1 : vector<2x16x16xf32>, i32 -> vector<2x16x16xf32>
    %25 = arith.addf %23, %24 : vector<2x16x16xf32>
    %c12_i32_13 = arith.constant 12 : i32
    %26 = tpu.dynamic_rotate %23 by %c12_i32_13 dim 1 : vector<2x16x16xf32>, i32 -> vector<2x16x16xf32>
    %27 = arith.addf %25, %26 : vector<2x16x16xf32>
    %c10_i32_14 = arith.constant 10 : i32
    %28 = tpu.dynamic_rotate %21 by %c10_i32_14 dim 1 : vector<2x16x16xf32>, i32 -> vector<2x16x16xf32>
    %29 = arith.addf %27, %28 : vector<2x16x16xf32>
    %cst_15 = arith.constant 0.0204081628 : f32
    %30 = vector.broadcast %cst_15 : f32 to vector<2x16x16xf32>
    %31 = arith.mulf %29, %30 : vector<2x16x16xf32>
    %c15_i32_16 = arith.constant 15 : i32
    %32 = tpu.dynamic_rotate %13 by %c15_i32_16 dim 2 : vector<2x16x16xf32>, i32 -> vector<2x16x16xf32>
    %33 = arith.addf %13, %32 : vector<2x16x16xf32>
    %c14_i32_17 = arith.constant 14 : i32
    %34 = tpu.dynamic_rotate %33 by %c14_i32_17 dim 2 : vector<2x16x16xf32>, i32 -> vector<2x16x16xf32>
    %35 = arith.addf %33, %34 : vector<2x16x16xf32>
    %c12_i32_18 = arith.constant 12 : i32
    %36 = tpu.dynamic_rotate %33 by %c12_i32_18 dim 2 : vector<2x16x16xf32>, i32 -> vector<2x16x16xf32>
    %37 = arith.addf %35, %36 : vector<2x16x16xf32>
    %c10_i32_19 = arith.constant 10 : i32
    %38 = tpu.dynamic_rotate %13 by %c10_i32_19 dim 2 : vector<2x16x16xf32>, i32 -> vector<2x16x16xf32>
    %39 = arith.addf %37, %38 : vector<2x16x16xf32>
    %c15_i32_20 = arith.constant 15 : i32
    %40 = tpu.dynamic_rotate %39 by %c15_i32_20 dim 1 : vector<2x16x16xf32>, i32 -> vector<2x16x16xf32>
    %41 = arith.addf %39, %40 : vector<2x16x16xf32>
    %c14_i32_21 = arith.constant 14 : i32
    %42 = tpu.dynamic_rotate %41 by %c14_i32_21 dim 1 : vector<2x16x16xf32>, i32 -> vector<2x16x16xf32>
    %43 = arith.addf %41, %42 : vector<2x16x16xf32>
    %c12_i32_22 = arith.constant 12 : i32
    %44 = tpu.dynamic_rotate %41 by %c12_i32_22 dim 1 : vector<2x16x16xf32>, i32 -> vector<2x16x16xf32>
    %45 = arith.addf %43, %44 : vector<2x16x16xf32>
    %c10_i32_23 = arith.constant 10 : i32
    %46 = tpu.dynamic_rotate %39 by %c10_i32_23 dim 1 : vector<2x16x16xf32>, i32 -> vector<2x16x16xf32>
    %47 = arith.addf %45, %46 : vector<2x16x16xf32>
    %cst_24 = arith.constant 0.0204081628 : f32
    %48 = vector.broadcast %cst_24 : f32 to vector<2x16x16xf32>
    %49 = arith.mulf %47, %48 : vector<2x16x16xf32>
    %50 = arith.mulf %12, %12 : vector<2x16x16xf32>
    %c15_i32_25 = arith.constant 15 : i32
    %51 = tpu.dynamic_rotate %50 by %c15_i32_25 dim 2 : vector<2x16x16xf32>, i32 -> vector<2x16x16xf32>
    %52 = arith.addf %50, %51 : vector<2x16x16xf32>
    %c14_i32_26 = arith.constant 14 : i32
    %53 = tpu.dynamic_rotate %52 by %c14_i32_26 dim 2 : vector<2x16x16xf32>, i32 -> vector<2x16x16xf32>
    %54 = arith.addf %52, %53 : vector<2x16x16xf32>
    %c12_i32_27 = arith.constant 12 : i32
    %55 = tpu.dynamic_rotate %52 by %c12_i32_27 dim 2 : vector<2x16x16xf32>, i32 -> vector<2x16x16xf32>
    %56 = arith.addf %54, %55 : vector<2x16x16xf32>
    %c10_i32_28 = arith.constant 10 : i32
    %57 = tpu.dynamic_rotate %50 by %c10_i32_28 dim 2 : vector<2x16x16xf32>, i32 -> vector<2x16x16xf32>
    %58 = arith.addf %56, %57 : vector<2x16x16xf32>
    %c15_i32_29 = arith.constant 15 : i32
    %59 = tpu.dynamic_rotate %58 by %c15_i32_29 dim 1 : vector<2x16x16xf32>, i32 -> vector<2x16x16xf32>
    %60 = arith.addf %58, %59 : vector<2x16x16xf32>
    %c14_i32_30 = arith.constant 14 : i32
    %61 = tpu.dynamic_rotate %60 by %c14_i32_30 dim 1 : vector<2x16x16xf32>, i32 -> vector<2x16x16xf32>
    %62 = arith.addf %60, %61 : vector<2x16x16xf32>
    %c12_i32_31 = arith.constant 12 : i32
    %63 = tpu.dynamic_rotate %60 by %c12_i32_31 dim 1 : vector<2x16x16xf32>, i32 -> vector<2x16x16xf32>
    %64 = arith.addf %62, %63 : vector<2x16x16xf32>
    %c10_i32_32 = arith.constant 10 : i32
    %65 = tpu.dynamic_rotate %58 by %c10_i32_32 dim 1 : vector<2x16x16xf32>, i32 -> vector<2x16x16xf32>
    %66 = arith.addf %64, %65 : vector<2x16x16xf32>
    %cst_33 = arith.constant 0.0204081628 : f32
    %67 = vector.broadcast %cst_33 : f32 to vector<2x16x16xf32>
    %68 = arith.mulf %66, %67 : vector<2x16x16xf32>
    %69 = arith.mulf %13, %13 : vector<2x16x16xf32>
    %c15_i32_34 = arith.constant 15 : i32
    %70 = tpu.dynamic_rotate %69 by %c15_i32_34 dim 2 : vector<2x16x16xf32>, i32 -> vector<2x16x16xf32>
    %71 = arith.addf %69, %70 : vector<2x16x16xf32>
    %c14_i32_35 = arith.constant 14 : i32
    %72 = tpu.dynamic_rotate %71 by %c14_i32_35 dim 2 : vector<2x16x16xf32>, i32 -> vector<2x16x16xf32>
    %73 = arith.addf %71, %72 : vector<2x16x16xf32>
    %c12_i32_36 = arith.constant 12 : i32
    %74 = tpu.dynamic_rotate %71 by %c12_i32_36 dim 2 : vector<2x16x16xf32>, i32 -> vector<2x16x16xf32>
    %75 = arith.addf %73, %74 : vector<2x16x16xf32>
    %c10_i32_37 = arith.constant 10 : i32
    %76 = tpu.dynamic_rotate %69 by %c10_i32_37 dim 2 : vector<2x16x16xf32>, i32 -> vector<2x16x16xf32>
    %77 = arith.addf %75, %76 : vector<2x16x16xf32>
    %c15_i32_38 = arith.constant 15 : i32
    %78 = tpu.dynamic_rotate %77 by %c15_i32_38 dim 1 : vector<2x16x16xf32>, i32 -> vector<2x16x16xf32>
    %79 = arith.addf %77, %78 : vector<2x16x16xf32>
    %c14_i32_39 = arith.constant 14 : i32
    %80 = tpu.dynamic_rotate %79 by %c14_i32_39 dim 1 : vector<2x16x16xf32>, i32 -> vector<2x16x16xf32>
    %81 = arith.addf %79, %80 : vector<2x16x16xf32>
    %c12_i32_40 = arith.constant 12 : i32
    %82 = tpu.dynamic_rotate %79 by %c12_i32_40 dim 1 : vector<2x16x16xf32>, i32 -> vector<2x16x16xf32>
    %83 = arith.addf %81, %82 : vector<2x16x16xf32>
    %c10_i32_41 = arith.constant 10 : i32
    %84 = tpu.dynamic_rotate %77 by %c10_i32_41 dim 1 : vector<2x16x16xf32>, i32 -> vector<2x16x16xf32>
    %85 = arith.addf %83, %84 : vector<2x16x16xf32>
    %cst_42 = arith.constant 0.0204081628 : f32
    %86 = vector.broadcast %cst_42 : f32 to vector<2x16x16xf32>
    %87 = arith.mulf %85, %86 : vector<2x16x16xf32>
    %88 = arith.mulf %12, %13 : vector<2x16x16xf32>
    %c15_i32_43 = arith.constant 15 : i32
    %89 = tpu.dynamic_rotate %88 by %c15_i32_43 dim 2 : vector<2x16x16xf32>, i32 -> vector<2x16x16xf32>
    %90 = arith.addf %88, %89 : vector<2x16x16xf32>
    %c14_i32_44 = arith.constant 14 : i32
    %91 = tpu.dynamic_rotate %90 by %c14_i32_44 dim 2 : vector<2x16x16xf32>, i32 -> vector<2x16x16xf32>
    %92 = arith.addf %90, %91 : vector<2x16x16xf32>
    %c12_i32_45 = arith.constant 12 : i32
    %93 = tpu.dynamic_rotate %90 by %c12_i32_45 dim 2 : vector<2x16x16xf32>, i32 -> vector<2x16x16xf32>
    %94 = arith.addf %92, %93 : vector<2x16x16xf32>
    %c10_i32_46 = arith.constant 10 : i32
    %95 = tpu.dynamic_rotate %88 by %c10_i32_46 dim 2 : vector<2x16x16xf32>, i32 -> vector<2x16x16xf32>
    %96 = arith.addf %94, %95 : vector<2x16x16xf32>
    %c15_i32_47 = arith.constant 15 : i32
    %97 = tpu.dynamic_rotate %96 by %c15_i32_47 dim 1 : vector<2x16x16xf32>, i32 -> vector<2x16x16xf32>
    %98 = arith.addf %96, %97 : vector<2x16x16xf32>
    %c14_i32_48 = arith.constant 14 : i32
    %99 = tpu.dynamic_rotate %98 by %c14_i32_48 dim 1 : vector<2x16x16xf32>, i32 -> vector<2x16x16xf32>
    %100 = arith.addf %98, %99 : vector<2x16x16xf32>
    %c12_i32_49 = arith.constant 12 : i32
    %101 = tpu.dynamic_rotate %98 by %c12_i32_49 dim 1 : vector<2x16x16xf32>, i32 -> vector<2x16x16xf32>
    %102 = arith.addf %100, %101 : vector<2x16x16xf32>
    %c10_i32_50 = arith.constant 10 : i32
    %103 = tpu.dynamic_rotate %96 by %c10_i32_50 dim 1 : vector<2x16x16xf32>, i32 -> vector<2x16x16xf32>
    %104 = arith.addf %102, %103 : vector<2x16x16xf32>
    %cst_51 = arith.constant 0.0204081628 : f32
    %105 = vector.broadcast %cst_51 : f32 to vector<2x16x16xf32>
    %106 = arith.mulf %104, %105 : vector<2x16x16xf32>
    %107 = arith.mulf %31, %31 : vector<2x16x16xf32>
    %108 = arith.subf %68, %107 : vector<2x16x16xf32>
    %cst_52 = arith.constant 1.02083337 : f32
    %109 = vector.broadcast %cst_52 : f32 to vector<2x16x16xf32>
    %110 = arith.mulf %109, %108 : vector<2x16x16xf32>
    %111 = arith.mulf %49, %49 : vector<2x16x16xf32>
    %112 = arith.subf %87, %111 : vector<2x16x16xf32>
    %cst_53 = arith.constant 1.02083337 : f32
    %113 = vector.broadcast %cst_53 : f32 to vector<2x16x16xf32>
    %114 = arith.mulf %113, %112 : vector<2x16x16xf32>
    %115 = arith.mulf %31, %49 : vector<2x16x16xf32>
    %116 = arith.subf %106, %115 : vector<2x16x16xf32>
    %cst_54 = arith.constant 1.02083337 : f32
    %117 = vector.broadcast %cst_54 : f32 to vector<2x16x16xf32>
    %118 = arith.mulf %117, %116 : vector<2x16x16xf32>
    %cst_55 = arith.constant 0.00999999977 : f32
    %119 = arith.mulf %cst_55, %3 : f32
    %120 = arith.mulf %119, %119 : f32
    %cst_56 = arith.constant 3.000000e-02 : f32
    %121 = arith.mulf %cst_56, %3 : f32
    %122 = arith.mulf %121, %121 : f32
    %cst_57 = arith.constant 2.000000e+00 : f32
    %123 = vector.broadcast %cst_57 : f32 to vector<2x16x16xf32>
    %124 = arith.mulf %123, %31 : vector<2x16x16xf32>
    %125 = arith.mulf %124, %49 : vector<2x16x16xf32>
    %126 = vector.broadcast %120 : f32 to vector<2x16x16xf32>
    %127 = arith.addf %125, %126 : vector<2x16x16xf32>
    %cst_58 = arith.constant 2.000000e+00 : f32
    %128 = vector.broadcast %cst_58 : f32 to vector<2x16x16xf32>
    %129 = arith.mulf %128, %118 : vector<2x16x16xf32>
    %130 = vector.broadcast %122 : f32 to vector<2x16x16xf32>
    %131 = arith.addf %129, %130 : vector<2x16x16xf32>
    %132 = arith.mulf %31, %31 : vector<2x16x16xf32>
    %133 = arith.mulf %49, %49 : vector<2x16x16xf32>
    %134 = arith.addf %132, %133 : vector<2x16x16xf32>
    %135 = vector.broadcast %120 : f32 to vector<2x16x16xf32>
    %136 = arith.addf %134, %135 : vector<2x16x16xf32>
    %137 = arith.addf %110, %114 : vector<2x16x16xf32>
    %138 = vector.broadcast %122 : f32 to vector<2x16x16xf32>
    %139 = arith.addf %137, %138 : vector<2x16x16xf32>
    %140 = arith.mulf %136, %139 : vector<2x16x16xf32>
    %141 = tpu.reciprocal %140 {approx = true} : vector<2x16x16xf32> -> vector<2x16x16xf32>
    %142 = arith.mulf %140, %141 : vector<2x16x16xf32>
    %cst_59 = arith.constant 2.000000e+00 : f32
    %143 = vector.broadcast %cst_59 : f32 to vector<2x16x16xf32>
    %144 = arith.subf %143, %142 : vector<2x16x16xf32>
    %145 = arith.mulf %141, %144 : vector<2x16x16xf32>
    %146 = arith.mulf %127, %131 : vector<2x16x16xf32>
    %147 = arith.mulf %146, %145 : vector<2x16x16xf32>
    %148 = tpu.iota {dimensions = array<i32: 1>} : vector<2x16x16xi32>
    %149 = tpu.iota {dimensions = array<i32: 2>} : vector<2x16x16xi32>
    %c10_i32_60 = arith.constant 10 : i32
    %150 = vector.broadcast %c10_i32_60 : i32 to vector<2x16x16xi32>
    %151 = arith.cmpi slt, %148, %150 : vector<2x16x16xi32>
    %c10_i32_61 = arith.constant 10 : i32
    %152 = vector.broadcast %c10_i32_61 : i32 to vector<2x16x16xi32>
    %153 = arith.cmpi slt, %149, %152 : vector<2x16x16xi32>
    %154 = arith.andi %151, %153 : vector<2x16x16xi1>
    %cst_62 = arith.constant 0.000000e+00 : f32
    %155 = vector.broadcast %cst_62 : f32 to vector<2x16x16xf32>
    %156 = arith.select %154, %147, %155 : vector<2x16x16xi1>, vector<2x16x16xf32>
    %157 = vector.shape_cast %156 : vector<2x16x16xf32> to vector<1x2x16x16xf32>
    %cst_63 = arith.constant dense<0.000000e+00> : vector<1xf32>
    %158 = vector.multi_reduction <add>, %157, %cst_63 [1, 2, 3] : vector<1x2x16x16xf32> to vector<1xf32>
    %159 = vector.shape_cast %158 : vector<1xf32> to vector<1x1x1x1xf32>
    %160 = vector.extract %159[0, 0, 0, 0] : f32 from vector<1x1x1x1xf32>
    %c0_64 = arith.constant 0 : index
    %c0_65 = arith.constant 0 : index
    %161 = memref.load %arg6[%c0_64, %c0_65] : memref<1x1xf32, #tpu.memory_space<smem>>
    memref.store %160, %arg6[%c0_64, %c0_65] : memref<1x1xf32, #tpu.memory_space<smem>>
    return
  }
  func.func @transform_0(%arg0: i32) -> (i32, i32, i32) {
    %c0_i32 = arith.constant 0 : i32
    %c0_i32_0 = arith.constant 0 : i32
    %c0_i32_1 = arith.constant 0 : i32
    return %arg0, %c0_i32, %c0_i32_0 : i32, i32, i32
  }
  func.func @transform_1(%arg0: i32) -> (i32, i32, i32) {
    %c0_i32 = arith.constant 0 : i32
    %c0_i32_0 = arith.constant 0 : i32
    %c0_i32_1 = arith.constant 0 : i32
    return %arg0, %c0_i32, %c0_i32_0 : i32, i32, i32
  }
  func.func @transform_2(%arg0: i32) -> (i32, i32, i32) {
    %c0_i32 = arith.constant 0 : i32
    %c0_i32_0 = arith.constant 0 : i32
    %c0_i32_1 = arith.constant 0 : i32
    return %arg0, %c0_i32, %c0_i32_0 : i32, i32, i32
  }
  func.func @transform_3(%arg0: i32) -> i32 {
    %c0_i32 = arith.constant 0 : i32
    %c0_i32_0 = arith.constant 0 : i32
    return %c0_i32 : i32
  }
  func.func @transform_4(%arg0: i32) -> (i32, i32) {
    %c0_i32 = arith.constant 0 : i32
    %c0_i32_0 = arith.constant 0 : i32
    return %arg0, %c0_i32 : i32, i32
  }
  func.func @transform_5(%arg0: i32) -> (i32, i32) {
    %c0_i32 = arith.constant 0 : i32
    %c0_i32_0 = arith.constant 0 : i32
    return %arg0, %c0_i32 : i32, i32
  }
}

</mosaic_0001>

<bundles_post_ra>
// kernel: tpu_custom_call.1
= control target key start
LH: loop header
LB: loop body
LE: loop exit
PB: predicated region body
PF: predicated region fallthrough
CT: control target
= control target key end

     0   :  { %12 = vsyncpa [#allocation4], 0  ;;  %s2409_s0 = inlined_call_operand.hbm [shape: f32[2,16,16], index: 0, kind: input, shape index: {}]   ;;  %s2410_s1 = inlined_call_operand.hbm [shape: f32[2,16,16], index: 1, kind: input, shape index: {}]   ;;  %s2411_s2 = inlined_call_operand.hbm [shape: f32[2,16,16], index: 2, kind: input, shape index: {}]   ;;  %s2412_s3 = inlined_call_operand.<no memory space> [shape: f32[1], index: 3, kind: input, shape index: {}]   ;;  %s2413_s4 = inlined_call_operand.hbm [shape: f32[1,1], index: 4, kind: output, shape index: {0}]   ;;  %s2414_s5 = inlined_call_operand.hbm [shape: f32[1,1], index: 5, kind: output, shape index: {1}]  }
   0x1   :  { %13 = vsyncpa [#allocation7], 0 }
   0x2   :  { %14 = vsyncpa [#allocation5], 0 }
   0x3   :  { %15 = vsyncpa [#allocation11], 0  ;;  %s1275_s18 = smov [#allocation6]   ;;  %s1276_s20 = smov [#allocation3]  }
   0x4   :  { %s33_s19 = sshll.u32 %s1275_s18, 4  ;;  %s21_s21 = sshll.u32 %s1276_s20, 4  ;;  %s34_s19 = int_to_ptr.vmem [resolvable:$true] %s33_s19  ;;  %s1317_s21 = int_to_ptr.vmem [resolvable:$true] %s21_s21 }
   0x5   :  { %s1181_s24 = scalar_lea.hbm %s2410_s1, 512 }
   0x6   :  { %p1182_p0 = scmp.ne.s32.totalorder %s2410_s1, %s1181_s24  ;;  %p1185_p1 = scmp.lt.u32.totalorder %s1181_s24, %s2410_s1 }
   0x8   :  { %p1187_p2 = pnand %p1185_p1, %p1182_p0 }
   0xa   :  { %1190 = shalt.err (!%p1187_p2)
}
   0xb   :  { %s1191_s29 = scalar_lea.vmem %s34_s19, 512  ;;  %p1196_p4 = scmp.lt.s32.totalorder %s34_s19, %s34_s19 }
   0xc   :  { %p1192_p3 = scmp.ne.s32.totalorder %s34_s19, %s1191_s29  ;;  %p1197_p5 = scmp.lt.s32.totalorder %s1191_s29, %s1191_s29 }
   0xe   :  { %p1198_p6 = por %p1197_p5, %p1196_p4 }
  0x10   :  { %p1199_p7 = pnand %p1198_p6, %p1192_p3 }
  0x12   :  { %1202 = shalt.err (!%p1199_p7)
}
  0x13   :  { %s1277_s30 = smov 128   ;;  %s1278_s6 = smov 8  }
  0x14   :  { %39 = dma.hbm_to_vmem [thread:$0]  %s2410_s1, 512, %s34_s19, [#allocation7], %s1277_s30, %s1277_s30, %s1278_s6  }
  0x15   :  { %s1203_s11 = scalar_lea.hbm %s2409_s0, 512 }
  0x16   :  { %p1204_p8 = scmp.ne.s32.totalorder %s2409_s0, %s1203_s11  ;;  %p1207_p9 = scmp.lt.u32.totalorder %s1203_s11, %s2409_s0 }
  0x18   :  { %p1209_p10 = pnand %p1207_p9, %p1204_p8 }
  0x1a   :  { %1212 = shalt.err (!%p1209_p10)
}
  0x1b   :  { %s1213_s16 = scalar_lea.vmem %s1317_s21, 512  ;;  %p1218_p12 = scmp.lt.s32.totalorder %s1317_s21, %s1317_s21 }
  0x1c   :  { %p1214_p11 = scmp.ne.s32.totalorder %s1317_s21, %s1213_s16  ;;  %p1219_p13 = scmp.lt.s32.totalorder %s1213_s16, %s1213_s16 }
  0x1e   :  { %p1220_p0 = por %p1219_p13, %p1218_p12 }
  0x20   :  { %p1221_p1 = pnand %p1220_p0, %p1214_p11 }
  0x22   :  { %1224 = shalt.err (!%p1221_p1)
}
  0x23   :  { %27 = dma.hbm_to_vmem [thread:$0]  %s2409_s0, 512, %s1317_s21, [#allocation4], %s1277_s30, %s1277_s30, %s1278_s6  }
  0x24   :  { %s1279_s18 = smov [#allocation8]   ;;  %s1225_s23 = scalar_lea.hbm %s2411_s2, 512 }
  0x25   :  { %s45_s19 = sshll.u32 %s1279_s18, 4  ;;  %p1226_p2 = scmp.ne.s32.totalorder %s2411_s2, %s1225_s23  ;;  %s46_s19 = int_to_ptr.vmem [resolvable:$true] %s45_s19 }
  0x26   :  { %p1229_p3 = scmp.lt.u32.totalorder %s1225_s23, %s2411_s2 }
  0x28   :  { %p1231_p4 = pnand %p1229_p3, %p1226_p2 }
  0x2a   :  { %1234 = shalt.err (!%p1231_p4)
}
  0x2b   :  { %s1235_s28 = scalar_lea.vmem %s46_s19, 512  ;;  %p1240_p6 = scmp.lt.s32.totalorder %s46_s19, %s46_s19 }
  0x2c   :  { %p1236_p5 = scmp.ne.s32.totalorder %s46_s19, %s1235_s28  ;;  %p1241_p7 = scmp.lt.s32.totalorder %s1235_s28, %s1235_s28 }
  0x2e   :  { %p1242_p8 = por %p1241_p7, %p1240_p6 }
  0x30   :  { %p1243_p9 = pnand %p1242_p8, %p1236_p5 }
  0x32   :  { %1246 = shalt.err (!%p1243_p9)
}
  0x33   :  { %51 = dma.hbm_to_vmem [thread:$0]  %s2411_s2, 512, %s46_s19, [#allocation7], %s1277_s30, %s1277_s30, %s1278_s6  }
  0x34   :  { %1267 = dma.done.wait [#allocation4], 512  }
  0x35   :  { %1268 = vsyncadd [#allocation4], 4294966784 }
  0x36   :  { %1269 = dma.done.wait [#allocation7], 1024  }
  0x37   :  { %1270 = vsyncadd [#allocation7], 4294966272  ;;  %v1369_v0 = vld [vmem:[#allocation3] sm:$0xff]  ;;  %v1383_v5 = vld [vmem:[#allocation3 + $0x8] sm:$0xff]  ;;  %s1280_s2 = smov 16   ;;  %vm115_vm0 = vcmask 1047680  }
  0x38   :  { %v1371_v1 = vld [vmem:[#allocation6] sm:$0xff]  ;;  %v1385_v6 = vld [vmem:[#allocation6 + $0x8] sm:$0xff]  ;;  %v1401_v10 = vld [vmem:[#allocation3 + $0x10] sm:$0xff]  ;;  %s1281_s29 = smov 127   ;;  %s1282_s30 = smov 122   ;;  %vm88_vm1 = vcmask 130048  }
  0x39   :  { %v1373_v2 = vld [vmem:[#allocation8] sm:$0xff]  ;;  %v1377_v3 = vmul.f32 %v1371_v1, %v1369_v0  ;;  %v1387_v7 = vld [vmem:[#allocation8 + $0x8] sm:$0xff]  ;;  %v1395_v8 = vmul.f32 %v1385_v6, %v1383_v5  ;;  %v1403_v11 = vld [vmem:[#allocation6 + $0x10] sm:$0xff]  ;;  %s1283_s6 = smov 126   ;;  %s1284_s7 = smov 124  }
  0x3a   :  { %v1381_v4 = vmul.f32 %v1373_v2, %v1371_v1  ;;  %v1399_v9 = vmul.f32 %v1387_v7, %v1385_v6  ;;  %v1405_v12 = vld [vmem:[#allocation3 + $0x18] sm:$0xff]  ;;  %v1415_v14 = vmul.f32 %v1403_v11, %v1401_v10  ;;  %v1421_v16 = vld [vmem:[#allocation8 + $0x10] sm:$0xff]  ;;  %s1032_s10 = smul.f32 0.03, %s2412_s3  ;;  %s1247_s17 = scalar_lea.hbm %s2413_s4, 16 }
  0x3b   :  { %116 = vrot.lane.b32.xlu0 %v1377_v3, %s1280_s2  ;;  %v1407_v13 = vld [vmem:[#allocation6 + $0x18] sm:$0xff]  ;;  %v1431_v18 = vmul.f32 %v1421_v16, %v1403_v11  ;;  %v1443_v20 = vmul.f32 %v1377_v3, %v1377_v3  ;;  %v1447_v21 = vmul.f32 %v1395_v8, %v1395_v8  ;;  %s1030_s14 = smul.f32 0.01, %s2412_s3  ;;  %p1248_p10 = scmp.ne.s32.totalorder %s2413_s4, %s1247_s17 }
  0x3c   :  { %294 = vrot.lane.b32.xlu1 %v1381_v4, %s1280_s2  ;;  %v1419_v15 = vmul.f32 %v1407_v13, %v1405_v12  ;;  %v1423_v17 = vld [vmem:[#allocation8 + $0x18] sm:$0xff]  ;;  %v1455_v22 = vmul.f32 %v1381_v4, %v1381_v4  ;;  %v1459_v23 = vmul.f32 %v1399_v9, %v1399_v9  ;;  %v1467_v24 = vmul.f32 %v1415_v14, %v1415_v14  ;;  %s1033_s11 = smul.f32 %s1032_s10, %s1032_s10  ;;  %p1251_p11 = scmp.lt.u32.totalorder %s1247_s17, %s2413_s4 }
  0x3d   :  { %v1435_v19 = vmul.f32 %v1423_v17, %v1407_v13  ;;  %v1479_v26 = vmul.f32 %v1431_v18, %v1431_v18  ;;  %v1491_v28 = vmul.f32 %v1381_v4, %v1377_v3  ;;  %v1495_v29 = vmul.f32 %v1399_v9, %v1395_v8  ;;  %s1031_s3 = smul.f32 %s1030_s14, %s1030_s14 }
  0x3e   :  { %v1471_v25 = vmul.f32 %v1419_v15, %v1419_v15  ;;  %v1503_v30 = vmul.f32 %v1431_v18, %v1415_v14  ;;  %p1253_p12 = pnand %p1251_p11, %p1248_p10 }
  0x3f   :  { %119 = vrot.lane.b32.xlu0 %v1395_v8, %s1280_s2  ;;  %v1483_v27 = vmul.f32 %v1435_v19, %v1435_v19  ;;  %v1507_v31 = vmul.f32 %v1435_v19, %v1419_v15 }
  0x40   :  { %297 = vrot.lane.b32.xlu1 %v1399_v9, %s1280_s2 }
  0x43   :  { %122 = vrot.lane.b32.xlu0 %v1415_v14, %s1280_s2 }
  0x44   :  { %125 = vrot.lane.b32.xlu1 %v1419_v15, %s1280_s2 }
  0x47   :  { %300 = vrot.lane.b32.xlu0 %v1431_v18, %s1280_s2 }
  0x48   :  { %303 = vrot.lane.b32.xlu1 %v1435_v19, %s1280_s2 }
  0x4b   :  { %470 = vrot.lane.b32.xlu0 %v1443_v20, %s1280_s2 }
  0x4c   :  { %473 = vrot.lane.b32.xlu1 %v1447_v21, %s1280_s2 }
  0x4f   :  { %646 = vrot.lane.b32.xlu0 %v1455_v22, %s1280_s2 }
  0x50   :  { %649 = vrot.lane.b32.xlu1 %v1459_v23, %s1280_s2 }
  0x53   :  { %476 = vrot.lane.b32.xlu0 %v1467_v24, %s1280_s2 }
  0x54   :  { %479 = vrot.lane.b32.xlu1 %v1471_v25, %s1280_s2 }
  0x57   :  { %652 = vrot.lane.b32.xlu0 %v1479_v26, %s1280_s2 }
  0x58   :  { %655 = vrot.lane.b32.xlu1 %v1483_v27, %s1280_s2 }
  0x5b   :  { %822 = vrot.lane.b32.xlu0 %v1491_v28, %s1280_s2 }
  0x5c   :  { %825 = vrot.lane.b32.xlu1 %v1495_v29, %s1280_s2 }
  0x5f   :  { %828 = vrot.lane.b32.xlu0 %v1503_v30, %s1280_s2 }
  0x60   :  { %831 = vrot.lane.b32.xlu1 %v1507_v31, %s1280_s2 }
  0xad   :  { %v117_v32 = vpop.permute.xlu0 %116 }
  0xae   :  { %v295_v33 = vpop.permute.xlu1 %294  ;;  %v118_v34 = vsel %vm115_vm0, %v117_v32, %v1377_v3 }
  0xaf   :  { %128 = vrot.lane.b32.xlu0 %v118_v34, %s1280_s2  ;;  %v296_v35 = vsel %vm115_vm0, %v295_v33, %v1381_v4 }
  0xb1   :  { %v120_v36 = vpop.permute.xlu0 %119 }
  0xb2   :  { %v298_v37 = vpop.permute.xlu1 %297  ;;  %v121_v38 = vsel %vm115_vm0, %v120_v36, %v1395_v8 }
  0xb3   :  { %130 = vrot.lane.b32.xlu1 %v121_v38, %s1280_s2  ;;  %306 = vrot.lane.b32.xlu0 %v296_v35, %s1280_s2  ;;  %v299_v39 = vsel %vm115_vm0, %v298_v37, %v1399_v9 }
  0xb5   :  { %v123_v40 = vpop.permute.xlu0 %122 }
  0xb6   :  { %v126_v41 = vpop.permute.xlu1 %125  ;;  %v124_v42 = vsel %vm115_vm0, %v123_v40, %v1415_v14 }
  0xb7   :  { %308 = vrot.lane.b32.xlu1 %v299_v39, %s1280_s2  ;;  %132 = vrot.lane.b32.xlu0 %v124_v42, %s1280_s2  ;;  %v127_v43 = vsel %vm115_vm0, %v126_v41, %v1419_v15 }
  0xb9   :  { %v301_v44 = vpop.permute.xlu0 %300 }
  0xba   :  { %v304_v45 = vpop.permute.xlu1 %303  ;;  %v302_v46 = vsel %vm115_vm0, %v301_v44, %v1431_v18 }
  0xbb   :  { %134 = vrot.lane.b32.xlu1 %v127_v43, %s1280_s2  ;;  %310 = vrot.lane.b32.xlu0 %v302_v46, %s1280_s2  ;;  %v305_v47 = vsel %vm115_vm0, %v304_v45, %v1435_v19 }
  0xbd   :  { %v471_v48 = vpop.permute.xlu0 %470 }
  0xbe   :  { %v474_v49 = vpop.permute.xlu1 %473  ;;  %v472_v50 = vsel %vm115_vm0, %v471_v48, %v1443_v20 }
  0xbf   :  { %312 = vrot.lane.b32.xlu1 %v305_v47, %s1280_s2  ;;  %482 = vrot.lane.b32.xlu0 %v472_v50, %s1280_s2  ;;  %v475_v51 = vsel %vm115_vm0, %v474_v49, %v1447_v21 }
  0xc1   :  { %v647_v52 = vpop.permute.xlu0 %646 }
  0xc2   :  { %v650_v53 = vpop.permute.xlu1 %649  ;;  %v648_v54 = vsel %vm115_vm0, %v647_v52, %v1455_v22 }
  0xc3   :  { %484 = vrot.lane.b32.xlu1 %v475_v51, %s1280_s2  ;;  %658 = vrot.lane.b32.xlu0 %v648_v54, %s1280_s2  ;;  %v651_v55 = vsel %vm115_vm0, %v650_v53, %v1459_v23 }
  0xc5   :  { %v477_v56 = vpop.permute.xlu0 %476 }
  0xc6   :  { %v480_v57 = vpop.permute.xlu1 %479  ;;  %v478_v58 = vsel %vm115_vm0, %v477_v56, %v1467_v24 }
  0xc7   :  { %660 = vrot.lane.b32.xlu1 %v651_v55, %s1280_s2  ;;  %486 = vrot.lane.b32.xlu0 %v478_v58, %s1280_s2  ;;  %v481_v59 = vsel %vm115_vm0, %v480_v57, %v1471_v25 }
  0xc9   :  { %v653_v60 = vpop.permute.xlu0 %652 }
  0xca   :  { %v656_v61 = vpop.permute.xlu1 %655  ;;  %v654_v62 = vsel %vm115_vm0, %v653_v60, %v1479_v26 }
  0xcb   :  { %488 = vrot.lane.b32.xlu1 %v481_v59, %s1280_s2  ;;  %662 = vrot.lane.b32.xlu0 %v654_v62, %s1280_s2  ;;  %v657_v63 = vsel %vm115_vm0, %v656_v61, %v1483_v27 }
  0xcd   :  { %v823_v32 = vpop.permute.xlu0 %822 }
  0xce   :  { %v826_v33 = vpop.permute.xlu1 %825  ;;  %v824_v34 = vsel %vm115_vm0, %v823_v32, %v1491_v28 }
  0xcf   :  { %664 = vrot.lane.b32.xlu1 %v657_v63, %s1280_s2  ;;  %834 = vrot.lane.b32.xlu0 %v824_v34, %s1280_s2  ;;  %v827_v35 = vsel %vm115_vm0, %v826_v33, %v1495_v29 }
  0xd1   :  { %v829_v36 = vpop.permute.xlu0 %828 }
  0xd2   :  { %v832_v37 = vpop.permute.xlu1 %831  ;;  %v830_v38 = vsel %vm115_vm0, %v829_v36, %v1503_v30 }
  0xd3   :  { %836 = vrot.lane.b32.xlu1 %v827_v35, %s1280_s2  ;;  %838 = vrot.lane.b32.xlu0 %v830_v38, %s1280_s2  ;;  %v833_v39 = vsel %vm115_vm0, %v832_v37, %v1507_v31 }
  0xd7   :  { %840 = vrot.lane.b32.xlu1 %v833_v39, %s1280_s2 }
 0x121   :  { %v129_v40 = vpop.permute.xlu0 %128 }
 0x122   :  { %v136_v41 = vsel %vm115_vm0, %v129_v40, %v1377_v3 }
 0x123   :  { %144 = vrot.lane.b32.xlu0 %v136_v41, %s1281_s29 }
 0x125   :  { %v131_v42 = vpop.permute.xlu1 %130  ;;  %v307_v43 = vpop.permute.xlu0 %306 }
 0x126   :  { %v137_v44 = vsel %vm115_vm0, %v131_v42, %v1395_v8  ;;  %v314_v45 = vsel %vm115_vm0, %v307_v43, %v1381_v4 }
 0x127   :  { %146 = vrot.lane.b32.xlu1 %v137_v44, %s1281_s29  ;;  %322 = vrot.lane.b32.xlu0 %v314_v45, %s1281_s29 }
 0x129   :  { %v309_v46 = vpop.permute.xlu1 %308  ;;  %v133_v47 = vpop.permute.xlu0 %132 }
 0x12a   :  { %v315_v48 = vsel %vm115_vm0, %v309_v46, %v1399_v9  ;;  %v138_v49 = vsel %vm115_vm0, %v133_v47, %v1415_v14 }
 0x12b   :  { %324 = vrot.lane.b32.xlu1 %v315_v48, %s1281_s29  ;;  %148 = vrot.lane.b32.xlu0 %v138_v49, %s1281_s29 }
 0x12d   :  { %v135_v50 = vpop.permute.xlu1 %134  ;;  %v311_v51 = vpop.permute.xlu0 %310 }
 0x12e   :  { %v139_v52 = vsel %vm115_vm0, %v135_v50, %v1419_v15  ;;  %v316_v53 = vsel %vm115_vm0, %v311_v51, %v1431_v18 }
 0x12f   :  { %150 = vrot.lane.b32.xlu1 %v139_v52, %s1281_s29  ;;  %326 = vrot.lane.b32.xlu0 %v316_v53, %s1281_s29 }
 0x131   :  { %v313_v54 = vpop.permute.xlu1 %312  ;;  %v483_v55 = vpop.permute.xlu0 %482 }
 0x132   :  { %v317_v56 = vsel %vm115_vm0, %v313_v54, %v1435_v19  ;;  %v490_v59 = vsel %vm115_vm0, %v483_v55, %v1443_v20 }
 0x133   :  { %328 = vrot.lane.b32.xlu1 %v317_v56, %s1281_s29  ;;  %220 = vrot.lane.b32.xlu0 %v136_v41, %s1282_s30 }
 0x135   :  { %v485_v57 = vpop.permute.xlu1 %484  ;;  %v659_v58 = vpop.permute.xlu0 %658 }
 0x136   :  { %v491_v62 = vsel %vm115_vm0, %v485_v57, %v1447_v21  ;;  %v666_v63 = vsel %vm115_vm0, %v659_v58, %v1455_v22 }
 0x137   :  { %222 = vrot.lane.b32.xlu1 %v137_v44, %s1282_s30  ;;  %398 = vrot.lane.b32.xlu0 %v314_v45, %s1282_s30 }
 0x139   :  { %v661_v60 = vpop.permute.xlu1 %660  ;;  %v487_v61 = vpop.permute.xlu0 %486 }
 0x13a   :  { %v667_v33 = vsel %vm115_vm0, %v661_v60, %v1459_v23  ;;  %v492_v34 = vsel %vm115_vm0, %v487_v61, %v1467_v24 }
 0x13b   :  { %400 = vrot.lane.b32.xlu1 %v315_v48, %s1282_s30  ;;  %498 = vrot.lane.b32.xlu0 %v490_v59, %s1281_s29 }
 0x13d   :  { %v489_v32 = vpop.permute.xlu1 %488  ;;  %v663_v35 = vpop.permute.xlu0 %662 }
 0x13e   :  { %v493_v36 = vsel %vm115_vm0, %v489_v32, %v1471_v25  ;;  %v1620_v37 = vsel %vm115_vm0, %v663_v35, %v1479_v26 }
 0x13f   :  { %500 = vrot.lane.b32.xlu1 %v491_v62, %s1281_s29  ;;  %674 = vrot.lane.b32.xlu0 %v666_v63, %s1281_s29 }
 0x141   :  { %v665_v38 = vpop.permute.xlu1 %664  ;;  %v835_v40 = vpop.permute.xlu0 %834 }
 0x142   :  { %v1627_v39 = vsel %vm115_vm0, %v665_v38, %v1483_v27  ;;  %v1636_v42 = vsel %vm115_vm0, %v835_v40, %v1491_v28 }
 0x143   :  { %676 = vrot.lane.b32.xlu1 %v667_v33, %s1281_s29  ;;  %502 = vrot.lane.b32.xlu0 %v492_v34, %s1281_s29 }
 0x145   :  { %v837_v41 = vpop.permute.xlu1 %836  ;;  %v839_v43 = vpop.permute.xlu0 %838 }
 0x146   :  { %v1643_v44 = vsel %vm115_vm0, %v837_v41, %v1495_v29  ;;  %v1647_v45 = vsel %vm115_vm0, %v839_v43, %v1503_v30 }
 0x147   :  { %504 = vrot.lane.b32.xlu1 %v493_v36, %s1281_s29  ;;  %678 = vrot.lane.b32.xlu0 %v1620_v37, %s1281_s29 }
 0x149   :  { %v841_v46 = vpop.permute.xlu1 %840 }
 0x14a   :  { %v1655_v47 = vsel %vm115_vm0, %v841_v46, %v1507_v31 }
 0x14b   :  { %680 = vrot.lane.b32.xlu1 %v1627_v39, %s1281_s29  ;;  %224 = vrot.lane.b32.xlu0 %v138_v49, %s1282_s30 }
 0x14f   :  { %226 = vrot.lane.b32.xlu1 %v139_v52, %s1282_s30  ;;  %402 = vrot.lane.b32.xlu0 %v316_v53, %s1282_s30 }
 0x153   :  { %404 = vrot.lane.b32.xlu1 %v317_v56, %s1282_s30  ;;  %850 = vrot.lane.b32.xlu0 %v1636_v42, %s1281_s29 }
 0x157   :  { %852 = vrot.lane.b32.xlu1 %v1643_v44, %s1281_s29  ;;  %854 = vrot.lane.b32.xlu0 %v1647_v45, %s1281_s29 }
 0x15b   :  { %856 = vrot.lane.b32.xlu1 %v1655_v47, %s1281_s29  ;;  %574 = vrot.lane.b32.xlu0 %v490_v59, %s1282_s30 }
 0x15f   :  { %576 = vrot.lane.b32.xlu1 %v491_v62, %s1282_s30  ;;  %750 = vrot.lane.b32.xlu0 %v666_v63, %s1282_s30 }
 0x163   :  { %752 = vrot.lane.b32.xlu1 %v667_v33, %s1282_s30  ;;  %578 = vrot.lane.b32.xlu0 %v492_v34, %s1282_s30 }
 0x167   :  { %580 = vrot.lane.b32.xlu1 %v493_v36, %s1282_s30 }
 0x195   :  { %v145_v48 = vpop.permute.xlu0 %144 }
 0x196   :  { %v1666_v49 = vadd.f32 %v145_v48, %v1377_v3 }
 0x198   :  { %160 = vrot.lane.b32.xlu0 %v1666_v49, %s1280_s2 }
 0x199   :  { %v147_v50 = vpop.permute.xlu1 %146  ;;  %v323_v51 = vpop.permute.xlu0 %322 }
 0x19a   :  { %v1671_v52 = vadd.f32 %v147_v50, %v1395_v8  ;;  %v1674_v53 = vadd.f32 %v323_v51, %v1381_v4 }
 0x19c   :  { %163 = vrot.lane.b32.xlu1 %v1671_v52, %s1280_s2  ;;  %338 = vrot.lane.b32.xlu0 %v1674_v53, %s1280_s2 }
 0x19d   :  { %v325_v54 = vpop.permute.xlu1 %324  ;;  %v149_v3 = vpop.permute.xlu0 %148 }
 0x19e   :  { %v1681_v55 = vadd.f32 %v325_v54, %v1399_v9  ;;  %v1684_v56 = vadd.f32 %v149_v3, %v1415_v14 }
 0x1a0   :  { %341 = vrot.lane.b32.xlu1 %v1681_v55, %s1280_s2  ;;  %166 = vrot.lane.b32.xlu0 %v1684_v56, %s1280_s2 }
 0x1a1   :  { %v151_v4 = vpop.permute.xlu1 %150  ;;  %v327_v8 = vpop.permute.xlu0 %326 }
 0x1a2   :  { %v1691_v57 = vadd.f32 %v151_v4, %v1419_v15  ;;  %v1694_v58 = vadd.f32 %v327_v8, %v1431_v18 }
 0x1a4   :  { %169 = vrot.lane.b32.xlu1 %v1691_v57, %s1280_s2  ;;  %344 = vrot.lane.b32.xlu0 %v1694_v58, %s1280_s2 }
 0x1a5   :  { %v329_v9 = vpop.permute.xlu1 %328  ;;  %v1700_v14 = vpop.permute.xlu0 %220 }
 0x1a6   :  { %v1703_v59 = vadd.f32 %v329_v9, %v1435_v19 }
 0x1a8   :  { %347 = vrot.lane.b32.xlu1 %v1703_v59, %s1280_s2 }
 0x1a9   :  { %v1707_v15 = vpop.permute.xlu1 %222  ;;  %v1709_v60 = vpop.permute.xlu0 %398 }
 0x1ad   :  { %v1711_v18 = vpop.permute.xlu1 %400  ;;  %v499_v61 = vpop.permute.xlu0 %498 }
 0x1ae   :  { %v1714_v62 = vadd.f32 %v499_v61, %v1443_v20 }
 0x1b0   :  { %514 = vrot.lane.b32.xlu0 %v1714_v62, %s1280_s2 }
 0x1b1   :  { %v501_v63 = vpop.permute.xlu1 %500  ;;  %v675_v32 = vpop.permute.xlu0 %674 }
 0x1b2   :  { %v1719_v19 = vadd.f32 %v501_v63, %v1447_v21  ;;  %v1722_v33 = vadd.f32 %v675_v32, %v1455_v22 }
 0x1b4   :  { %517 = vrot.lane.b32.xlu1 %v1719_v19, %s1280_s2  ;;  %690 = vrot.lane.b32.xlu0 %v1722_v33, %s1280_s2 }
 0x1b5   :  { %v677_v34 = vpop.permute.xlu1 %676  ;;  %v503_v20 = vpop.permute.xlu0 %502 }
 0x1b6   :  { %v1729_v35 = vadd.f32 %v677_v34, %v1459_v23  ;;  %v1732_v36 = vadd.f32 %v503_v20, %v1467_v24 }
 0x1b8   :  { %693 = vrot.lane.b32.xlu1 %v1729_v35, %s1280_s2  ;;  %520 = vrot.lane.b32.xlu0 %v1732_v36, %s1280_s2 }
 0x1b9   :  { %v505_v21 = vpop.permute.xlu1 %504  ;;  %v679_v22 = vpop.permute.xlu0 %678 }
 0x1ba   :  { %v1739_v38 = vadd.f32 %v505_v21, %v1471_v25  ;;  %v1742_v40 = vadd.f32 %v679_v22, %v1479_v26 }
 0x1bc   :  { %523 = vrot.lane.b32.xlu1 %v1739_v38, %s1280_s2  ;;  %696 = vrot.lane.b32.xlu0 %v1742_v40, %s1280_s2 }
 0x1bd   :  { %v681_v23 = vpop.permute.xlu1 %680  ;;  %v1748_v24 = vpop.permute.xlu0 %224 }
 0x1be   :  { %v1751_v41 = vadd.f32 %v681_v23, %v1483_v27 }
 0x1c0   :  { %699 = vrot.lane.b32.xlu1 %v1751_v41, %s1280_s2  ;;  %754 = vrot.lane.b32.xlu0 %v1620_v37, %s1282_s30 }
 0x1c1   :  { %v1757_v25 = vpop.permute.xlu1 %226  ;;  %v1759_v26 = vpop.permute.xlu0 %402 }
 0x1c4   :  { %756 = vrot.lane.b32.xlu1 %v1627_v39, %s1282_s30  ;;  %926 = vrot.lane.b32.xlu0 %v1636_v42, %s1282_s30 }
 0x1c5   :  { %v1765_v43 = vpop.permute.xlu1 %404  ;;  %v851_v27 = vpop.permute.xlu0 %850 }
 0x1c6   :  { %v1768_v46 = vadd.f32 %v851_v27, %v1491_v28 }
 0x1c8   :  { %928 = vrot.lane.b32.xlu1 %v1643_v44, %s1282_s30  ;;  %866 = vrot.lane.b32.xlu0 %v1768_v46, %s1280_s2 }
 0x1c9   :  { %v853_v37 = vpop.permute.xlu1 %852  ;;  %v855_v48 = vpop.permute.xlu0 %854 }
 0x1ca   :  { %v1775_v50 = vadd.f32 %v853_v37, %v1495_v29  ;;  %v1778_v39 = vadd.f32 %v855_v48, %v1503_v30 }
 0x1cc   :  { %869 = vrot.lane.b32.xlu1 %v1775_v50, %s1280_s2  ;;  %872 = vrot.lane.b32.xlu0 %v1778_v39, %s1280_s2 }
 0x1cd   :  { %v857_v28 = vpop.permute.xlu1 %856  ;;  %v1789_v44 = vpop.permute.xlu0 %574 }
 0x1ce   :  { %v1785_v42 = vadd.f32 %v857_v28, %v1507_v31 }
 0x1d0   :  { %875 = vrot.lane.b32.xlu1 %v1785_v42, %s1280_s2 }
 0x1d1   :  { %v1791_v29 = vpop.permute.xlu1 %576  ;;  %v1793_v51 = vpop.permute.xlu0 %750 }
 0x1d5   :  { %v1795_v30 = vpop.permute.xlu1 %752  ;;  %v1797_v54 = vpop.permute.xlu0 %578 }
 0x1d9   :  { %v1799_v3 = vpop.permute.xlu1 %580 }
 0x20a   :  { %v161_v4 = vpop.permute.xlu0 %160 }
 0x20b   :  { %v162_v31 = vsel %vm115_vm0, %v161_v4, %v1666_v49 }
 0x20c   :  { %172 = vrot.lane.b32.xlu0 %v162_v31, %s1280_s2 }
 0x20e   :  { %v164_v8 = vpop.permute.xlu1 %163  ;;  %v339_v9 = vpop.permute.xlu0 %338 }
 0x20f   :  { %v165_v61 = vsel %vm115_vm0, %v164_v8, %v1671_v52  ;;  %v340_v63 = vsel %vm115_vm0, %v339_v9, %v1674_v53 }
 0x210   :  { %174 = vrot.lane.b32.xlu1 %v165_v61, %s1280_s2  ;;  %350 = vrot.lane.b32.xlu0 %v340_v63, %s1280_s2 }
 0x212   :  { %v342_v32 = vpop.permute.xlu1 %341  ;;  %v167_v34 = vpop.permute.xlu0 %166 }
 0x213   :  { %v343_v20 = vsel %vm115_vm0, %v342_v32, %v1681_v55  ;;  %v168_v21 = vsel %vm115_vm0, %v167_v34, %v1684_v56 }
 0x214   :  { %352 = vrot.lane.b32.xlu1 %v343_v20, %s1280_s2  ;;  %176 = vrot.lane.b32.xlu0 %v168_v21, %s1280_s2 }
 0x216   :  { %v170_v22 = vpop.permute.xlu1 %169  ;;  %v345_v23 = vpop.permute.xlu0 %344 }
 0x217   :  { %v171_v27 = vsel %vm115_vm0, %v170_v22, %v1691_v57  ;;  %v346_v37 = vsel %vm115_vm0, %v345_v23, %v1694_v58 }
 0x218   :  { %178 = vrot.lane.b32.xlu1 %v171_v27, %s1280_s2  ;;  %354 = vrot.lane.b32.xlu0 %v346_v37, %s1280_s2 }
 0x21a   :  { %v348_v48 = vpop.permute.xlu1 %347 }
 0x21b   :  { %v349_v28 = vsel %vm115_vm0, %v348_v48, %v1703_v59 }
 0x21c   :  { %356 = vrot.lane.b32.xlu1 %v349_v28, %s1280_s2 }
 0x222   :  { %v515_v4 = vpop.permute.xlu0 %514 }
 0x223   :  { %v516_v31 = vsel %vm115_vm0, %v515_v4, %v1714_v62 }
 0x224   :  { %526 = vrot.lane.b32.xlu0 %v516_v31, %s1280_s2 }
 0x226   :  { %v518_v8 = vpop.permute.xlu1 %517  ;;  %v691_v9 = vpop.permute.xlu0 %690 }
 0x227   :  { %v519_v61 = vsel %vm115_vm0, %v518_v8, %v1719_v19  ;;  %v692_v63 = vsel %vm115_vm0, %v691_v9, %v1722_v33 }
 0x228   :  { %528 = vrot.lane.b32.xlu1 %v519_v61, %s1280_s2  ;;  %702 = vrot.lane.b32.xlu0 %v692_v63, %s1280_s2 }
 0x22a   :  { %v694_v32 = vpop.permute.xlu1 %693  ;;  %v521_v34 = vpop.permute.xlu0 %520 }
 0x22b   :  { %v695_v20 = vsel %vm115_vm0, %v694_v32, %v1729_v35  ;;  %v522_v21 = vsel %vm115_vm0, %v521_v34, %v1732_v36 }
 0x22c   :  { %704 = vrot.lane.b32.xlu1 %v695_v20, %s1280_s2  ;;  %530 = vrot.lane.b32.xlu0 %v522_v21, %s1280_s2 }
 0x22e   :  { %v524_v22 = vpop.permute.xlu1 %523  ;;  %v697_v23 = vpop.permute.xlu0 %696 }
 0x22f   :  { %v525_v27 = vsel %vm115_vm0, %v524_v22, %v1739_v38  ;;  %v698_v37 = vsel %vm115_vm0, %v697_v23, %v1742_v40 }
 0x230   :  { %532 = vrot.lane.b32.xlu1 %v525_v27, %s1280_s2  ;;  %706 = vrot.lane.b32.xlu0 %v698_v37, %s1280_s2 }
 0x232   :  { %v700_v48 = vpop.permute.xlu1 %699  ;;  %v1846_v28 = vpop.permute.xlu0 %754 }
 0x233   :  { %v701_v4 = vsel %vm115_vm0, %v700_v48, %v1751_v41 }
 0x234   :  { %708 = vrot.lane.b32.xlu1 %v701_v4, %s1280_s2 }
 0x236   :  { %v1851_v31 = vpop.permute.xlu1 %756  ;;  %v1853_v8 = vpop.permute.xlu0 %926 }
 0x23a   :  { %v1855_v9 = vpop.permute.xlu1 %928  ;;  %v867_v61 = vpop.permute.xlu0 %866 }
 0x23b   :  { %v868_v63 = vsel %vm115_vm0, %v867_v61, %v1768_v46 }
 0x23c   :  { %878 = vrot.lane.b32.xlu0 %v868_v63, %s1280_s2 }
 0x23e   :  { %v870_v32 = vpop.permute.xlu1 %869  ;;  %v873_v34 = vpop.permute.xlu0 %872 }
 0x23f   :  { %v871_v20 = vsel %vm115_vm0, %v870_v32, %v1775_v50  ;;  %v874_v21 = vsel %vm115_vm0, %v873_v34, %v1778_v39 }
 0x240   :  { %880 = vrot.lane.b32.xlu1 %v871_v20, %s1280_s2  ;;  %882 = vrot.lane.b32.xlu0 %v874_v21, %s1280_s2 }
 0x242   :  { %v876_v22 = vpop.permute.xlu1 %875 }
 0x243   :  { %v877_v23 = vsel %vm115_vm0, %v876_v22, %v1785_v42 }
 0x244   :  { %884 = vrot.lane.b32.xlu1 %v877_v23, %s1280_s2 }
 0x27e   :  { %v173_v27 = vpop.permute.xlu0 %172 }
 0x27f   :  { %v180_v37 = vsel %vm115_vm0, %v173_v27, %v1666_v49 }
 0x280   :  { %188 = vrot.lane.b32.xlu0 %v180_v37, %s1283_s6 }
 0x282   :  { %v175_v48 = vpop.permute.xlu1 %174  ;;  %v351_v4 = vpop.permute.xlu0 %350 }
 0x283   :  { %v181_v61 = vsel %vm115_vm0, %v175_v48, %v1671_v52  ;;  %v358_v63 = vsel %vm115_vm0, %v351_v4, %v1674_v53 }
 0x284   :  { %190 = vrot.lane.b32.xlu1 %v181_v61, %s1283_s6  ;;  %366 = vrot.lane.b32.xlu0 %v358_v63, %s1283_s6 }
 0x286   :  { %v353_v32 = vpop.permute.xlu1 %352  ;;  %v177_v34 = vpop.permute.xlu0 %176 }
 0x287   :  { %v359_v20 = vsel %vm115_vm0, %v353_v32, %v1681_v55  ;;  %v182_v21 = vsel %vm115_vm0, %v177_v34, %v1684_v56 }
 0x288   :  { %368 = vrot.lane.b32.xlu1 %v359_v20, %s1283_s6  ;;  %192 = vrot.lane.b32.xlu0 %v182_v21, %s1283_s6 }
 0x28a   :  { %v179_v22 = vpop.permute.xlu1 %178  ;;  %v355_v27 = vpop.permute.xlu0 %354 }
 0x28b   :  { %v183_v23 = vsel %vm115_vm0, %v179_v22, %v1691_v57  ;;  %v360_v48 = vsel %vm115_vm0, %v355_v27, %v1694_v58 }
 0x28c   :  { %194 = vrot.lane.b32.xlu1 %v183_v23, %s1283_s6  ;;  %204 = vrot.lane.b32.xlu0 %v180_v37, %s1284_s7 }
 0x28e   :  { %v357_v4 = vpop.permute.xlu1 %356 }
 0x28f   :  { %v361_v32 = vsel %vm115_vm0, %v357_v4, %v1703_v59 }
 0x290   :  { %206 = vrot.lane.b32.xlu1 %v181_v61, %s1284_s7  ;;  %370 = vrot.lane.b32.xlu0 %v360_v48, %s1283_s6 }
 0x294   :  { %372 = vrot.lane.b32.xlu1 %v361_v32, %s1283_s6  ;;  %382 = vrot.lane.b32.xlu0 %v358_v63, %s1284_s7 }
 0x296   :  { %v527_v34 = vpop.permute.xlu0 %526 }
 0x297   :  { %v534_v22 = vsel %vm115_vm0, %v527_v34, %v1714_v62 }
 0x298   :  { %384 = vrot.lane.b32.xlu1 %v359_v20, %s1284_s7  ;;  %208 = vrot.lane.b32.xlu0 %v182_v21, %s1284_s7 }
 0x29a   :  { %v529_v37 = vpop.permute.xlu1 %528  ;;  %v703_v61 = vpop.permute.xlu0 %702 }
 0x29b   :  { %v535_v63 = vsel %vm115_vm0, %v529_v37, %v1719_v19  ;;  %v710_v20 = vsel %vm115_vm0, %v703_v61, %v1722_v33 }
 0x29c   :  { %210 = vrot.lane.b32.xlu1 %v183_v23, %s1284_s7  ;;  %386 = vrot.lane.b32.xlu0 %v360_v48, %s1284_s7 }
 0x29e   :  { %v705_v27 = vpop.permute.xlu1 %704  ;;  %v531_v21 = vpop.permute.xlu0 %530 }
 0x29f   :  { %v711_v23 = vsel %vm115_vm0, %v705_v27, %v1729_v35  ;;  %v536_v48 = vsel %vm115_vm0, %v531_v21, %v1732_v36 }
 0x2a0   :  { %388 = vrot.lane.b32.xlu1 %v361_v32, %s1284_s7  ;;  %542 = vrot.lane.b32.xlu0 %v534_v22, %s1283_s6 }
 0x2a2   :  { %v533_v4 = vpop.permute.xlu1 %532  ;;  %v707_v34 = vpop.permute.xlu0 %706 }
 0x2a3   :  { %v537_v32 = vsel %vm115_vm0, %v533_v4, %v1739_v38  ;;  %v712_v37 = vsel %vm115_vm0, %v707_v34, %v1742_v40  ;;  %v76_v34 = vsub.f32 %v1369_v0, %v1373_v2 }
 0x2a4   :  { %544 = vrot.lane.b32.xlu1 %v535_v63, %s1283_s6  ;;  %718 = vrot.lane.b32.xlu0 %v710_v20, %s1283_s6 }
 0x2a6   :  { %v709_v61 = vpop.permute.xlu1 %708 }
 0x2a7   :  { %v713_v27 = vsel %vm115_vm0, %v709_v61, %v1751_v41  ;;  %v78_v61 = vsub.f32 %v1401_v10, %v1421_v16 }
 0x2a8   :  { %720 = vrot.lane.b32.xlu1 %v711_v23, %s1283_s6  ;;  %546 = vrot.lane.b32.xlu0 %v536_v48, %s1283_s6 }
 0x2ac   :  { %548 = vrot.lane.b32.xlu1 %v537_v32, %s1283_s6  ;;  %558 = vrot.lane.b32.xlu0 %v534_v22, %s1284_s7 }
 0x2ae   :  { %v879_v22 = vpop.permute.xlu0 %878 }
 0x2b0   :  { %560 = vrot.lane.b32.xlu1 %v535_v63, %s1284_s7  ;;  %722 = vrot.lane.b32.xlu0 %v712_v37, %s1283_s6  ;;  %v886_v63 = vsel %vm115_vm0, %v879_v22, %v1768_v46  ;;  %v80_v22 = vmul.f32 %v76_v34, %v1371_v1 }
 0x2b2   :  { %v881_v21 = vpop.permute.xlu1 %880  ;;  %v883_v4 = vpop.permute.xlu0 %882 }
 0x2b4   :  { %724 = vrot.lane.b32.xlu1 %v713_v27, %s1283_s6  ;;  %734 = vrot.lane.b32.xlu0 %v710_v20, %s1284_s7  ;;  %v887_v20 = vsel %vm115_vm0, %v881_v21, %v1775_v50 }
 0x2b8   :  { %736 = vrot.lane.b32.xlu1 %v711_v23, %s1284_s7  ;;  %562 = vrot.lane.b32.xlu0 %v536_v48, %s1284_s7  ;;  %v888_v23 = vsel %vm115_vm0, %v883_v4, %v1778_v39  ;;  %v885_v48 = vpop.permute.xlu1 %884 }
 0x2bc   :  { %564 = vrot.lane.b32.xlu1 %v537_v32, %s1284_s7  ;;  %738 = vrot.lane.b32.xlu0 %v712_v37, %s1284_s7  ;;  %v889_v32 = vsel %vm115_vm0, %v885_v48, %v1785_v42  ;;  %v77_v37 = vsub.f32 %v1383_v5, %v1387_v7 }
 0x2be   :  { %v81_v21 = vmul.f32 %v77_v37, %v1385_v6 }
 0x2c0   :  { %740 = vrot.lane.b32.xlu1 %v713_v27, %s1284_s7  ;;  %894 = vrot.lane.b32.xlu0 %v886_v63, %s1283_s6  ;;  %v79_v27 = vsub.f32 %v1405_v12, %v1423_v17  ;;  %v85_v0 = vmul.f32 %v81_v21, %v77_v37  ;;  %v240_v37 = vlaneseq }
 0x2c2   :  { %v90_v7 = vsel %vm88_vm1, %v85_v0, 0.0 }
 0x2c4   :  { %896 = vrot.lane.b32.xlu1 %v887_v20, %s1283_s6  ;;  %898 = vrot.lane.b32.xlu0 %v888_v23, %s1283_s6 }
 0x2c8   :  { %900 = vrot.lane.b32.xlu1 %v889_v32, %s1283_s6  ;;  %910 = vrot.lane.b32.xlu0 %v886_v63, %s1284_s7  ;;  %v84_v63 = vmul.f32 %v80_v22, %v76_v34  ;;  %v1972_v22 = vshrl.u32 %v240_v37, 7 }
 0x2ca   :  { %v89_v5 = vsel %vm88_vm1, %v84_v63, 0.0  ;;  %vm242_vm2 = vcmp.lt.s32.totalorder %v1972_v22, 7  ;;  %vm255_vm3 = vcmp.lt.s32.totalorder %v1972_v22, 6  ;;  %vm268_vm4 = vcmp.lt.s32.totalorder %v1972_v22, 4 }
 0x2cb   :  { %v91_v12 = vadd.f32 %v90_v7, %v89_v5  ;;  %vm281_vm5 = vcmp.lt.s32.totalorder %v1972_v22, 2 }
 0x2cc   :  { %912 = vrot.lane.b32.xlu1 %v887_v20, %s1284_s7  ;;  %914 = vrot.lane.b32.xlu0 %v888_v23, %s1284_s7 }
 0x2d0   :  { %916 = vrot.lane.b32.xlu1 %v889_v32, %s1284_s7  ;;  %930 = vrot.lane.b32.xlu0 %v1647_v45, %s1282_s30  ;;  %v82_v45 = vmul.f32 %v78_v61, %v1403_v11 }
 0x2d2   :  { %v86_v2 = vmul.f32 %v82_v45, %v78_v61 }
 0x2d4   :  { %932 = vrot.lane.b32.xlu1 %v1655_v47, %s1282_s30  ;;  %v83_v47 = vmul.f32 %v79_v27, %v1407_v13  ;;  %v92_v10 = vsel %vm88_vm1, %v86_v2, 0.0 }
 0x2d5   :  { %v93_v6 = vadd.f32 %v92_v10, %v91_v12 }
 0x2d6   :  { %v87_v4 = vmul.f32 %v83_v47, %v79_v27 }
 0x2d8   :  { %v94_v1 = vsel %vm88_vm1, %v87_v4, 0.0 }
 0x2d9   :  { %v95_v17 = vadd.f32 %v94_v1, %v93_v6 }
 0x2ef   :  { %96 = vadd.xlane.f32.xlu0 %v95_v17 }
 0x2f2   :  { %v189_v16 = vpop.permute.xlu0 %188 }
 0x2f3   :  { %v200_v48 = vadd.f32 %v189_v16, %v1666_v49 }
 0x2f6   :  { %v191_v11 = vpop.permute.xlu1 %190  ;;  %v367_v20 = vpop.permute.xlu0 %366 }
 0x2f7   :  { %v201_v27 = vadd.f32 %v191_v11, %v1671_v52  ;;  %v378_v0 = vadd.f32 %v367_v20, %v1674_v53 }
 0x2fa   :  { %v369_v13 = vpop.permute.xlu1 %368  ;;  %v193_v23 = vpop.permute.xlu0 %192 }
 0x2fb   :  { %v379_v10 = vadd.f32 %v369_v13, %v1681_v55  ;;  %v202_v6 = vadd.f32 %v193_v23, %v1684_v56 }
 0x2fe   :  { %v195_v32 = vpop.permute.xlu1 %194  ;;  %v205_v34 = vpop.permute.xlu0 %204 }
 0x2ff   :  { %v216_v61 = vadd.f32 %v205_v34, %v200_v48  ;;  %v203_v56 = vadd.f32 %v195_v32, %v1691_v57 }
 0x301   :  { %v232_v47 = vadd.f32 %v1700_v14, %v216_v61 }
 0x302   :  { %v207_v21 = vpop.permute.xlu1 %206  ;;  %v371_v45 = vpop.permute.xlu0 %370 }
 0x303   :  { %v217_v63 = vadd.f32 %v207_v21, %v201_v27  ;;  %v236_v52 = vrot.slane %v232_v47, 1  ;;  %v2010_v21 = vstv %s1033_s11 }
 0x305   :  { %v233_v2 = vadd.f32 %v1707_v15, %v217_v63 }
 0x306   :  { %v373_v49 = vpop.permute.xlu1 %372  ;;  %v383_v4 = vpop.permute.xlu0 %382 }
 0x307   :  { %v238_v5 = vrot.slane %v233_v2, 1  ;;  %v394_v7 = vadd.f32 %v383_v4, %v378_v0  ;;  %v279_v57 = vrot.slane %v233_v2, 6 }
 0x309   :  { %v243_v14 = vsel %vm242_vm2, %v236_v52, %v238_v5  ;;  %v245_v53 = vsel %vm242_vm2, %v238_v5, %v236_v52  ;;  %v1992_v17 = vadd.f32 %v1709_v60, %v394_v7 }
 0x30a   :  { %v1986_v15 = vadd.f32 %v243_v14, %v232_v47  ;;  %v1988_v12 = vadd.f32 %v245_v53, %v233_v2  ;;  %v385_v16 = vpop.permute.xlu1 %384  ;;  %v209_v1 = vpop.permute.xlu0 %208 }
 0x30b   :  { %v395_v11 = vadd.f32 %v385_v16, %v379_v10  ;;  %v218_v48 = vadd.f32 %v209_v1, %v202_v6  ;;  %v414_v61 = vrot.slane %v1992_v17, 1  ;;  %v380_v16 = vadd.f32 %v371_v45, %v1694_v58 }
 0x30c   :  { %v251_v55 = vrot.slane %v1986_v15, 2  ;;  %v253_v20 = vrot.slane %v1988_v12, 2  ;;  %v264_v63 = vrot.slane %v1986_v15, 4  ;;  %v266_v0 = vrot.slane %v1988_v12, 4 }
 0x30d   :  { %v2001_v13 = vadd.f32 %v1711_v18, %v395_v11  ;;  %v277_v18 = vrot.slane %v232_v47, 6  ;;  %v2019_v5 = vadd.f32 %v1748_v24, %v218_v48  ;;  %v381_v1 = vadd.f32 %v373_v49, %v1703_v59 }
 0x30e   :  { %v211_v60 = vpop.permute.xlu1 %210  ;;  %v387_v23 = vpop.permute.xlu0 %386  ;;  %v256_v34 = vsel %vm255_vm3, %v251_v55, %v253_v20  ;;  %v258_v7 = vsel %vm255_vm3, %v253_v20, %v251_v55  ;;  %v2031_v24 = vstv %s1031_s3  ;;  %v269_v58 = vsel %vm268_vm4, %v264_v63, %v266_v0 }
 0x30f   :  { %v416_v27 = vrot.slane %v2001_v13, 1  ;;  %v219_v32 = vadd.f32 %v211_v60, %v203_v56  ;;  %v260_v47 = vadd.f32 %v256_v34, %v1986_v15  ;;  %v282_v11 = vsel %vm281_vm5, %v277_v18, %v279_v57 }
 0x310   :  { %v284_v15 = vsel %vm281_vm5, %v279_v57, %v277_v18  ;;  %v261_v48 = vadd.f32 %v258_v7, %v1988_v12  ;;  %v237_v59 = vrot.slane %v2019_v5, 1  ;;  %v396_v60 = vadd.f32 %v387_v23, %v380_v16 }
 0x311   :  { %v418_v4 = vsel %vm242_vm2, %v414_v61, %v416_v27  ;;  %v420_v52 = vsel %vm242_vm2, %v416_v27, %v414_v61  ;;  %v2029_v6 = vadd.f32 %v1757_v25, %v219_v32  ;;  %v273_v45 = vadd.f32 %v269_v58, %v260_v47 }
 0x312   :  { %v422_v10 = vadd.f32 %v418_v4, %v1992_v17  ;;  %v423_v2 = vadd.f32 %v420_v52, %v2001_v13  ;;  %v389_v14 = vpop.permute.xlu1 %388  ;;  %v543_v53 = vpop.permute.xlu0 %542  ;;  %v450_v12 = vrot.slane %v1992_v17, 6  ;;  %v452_v57 = vrot.slane %v2001_v13, 6 }
 0x313   :  { %v239_v25 = vrot.slane %v2029_v6, 1  ;;  %v271_v23 = vsel %vm268_vm4, %v266_v0, %v264_v63  ;;  %v278_v47 = vrot.slane %v2019_v5, 6  ;;  %v2060_v13 = vadd.f32 %v1759_v26, %v396_v60 }
 0x314   :  { %v426_v55 = vrot.slane %v422_v10, 2  ;;  %v428_v20 = vrot.slane %v423_v2, 2  ;;  %v438_v27 = vrot.slane %v422_v10, 4  ;;  %v440_v18 = vrot.slane %v423_v2, 4 }
 0x315   :  { %v244_v52 = vsel %vm242_vm2, %v237_v59, %v239_v25  ;;  %v246_v7 = vsel %vm242_vm2, %v239_v25, %v237_v59  ;;  %v456_v60 = vsel %vm281_vm5, %v452_v57, %v450_v12 }
 0x316   :  { %v430_v49 = vsel %vm255_vm3, %v426_v55, %v428_v20  ;;  %v432_v56 = vsel %vm255_vm3, %v428_v20, %v426_v55  ;;  %v545_v34 = vpop.permute.xlu1 %544  ;;  %v2046_v61 = vpop.permute.xlu0 %718  ;;  %v249_v16 = vadd.f32 %v244_v52, %v2019_v5  ;;  %v250_v17 = vadd.f32 %v246_v7, %v2029_v6 }
 0x317   :  { %v434_v32 = vadd.f32 %v430_v49, %v422_v10  ;;  %v435_v4 = vadd.f32 %v432_v56, %v423_v2  ;;  %v274_v55 = vadd.f32 %v271_v23, %v261_v48  ;;  %v286_v20 = vadd.f32 %v282_v11, %v273_v45 }
 0x318   :  { %v397_v10 = vadd.f32 %v389_v14, %v381_v1  ;;  %v442_v59 = vsel %vm268_vm4, %v438_v27, %v440_v18  ;;  %v444_v63 = vsel %vm268_vm4, %v440_v18, %v438_v27  ;;  %v252_v0 = vrot.slane %v249_v16, 2 }
 0x319   :  { %v254_v25 = vrot.slane %v250_v17, 2  ;;  %v446_v49 = vadd.f32 %v442_v59, %v434_v32  ;;  %v447_v5 = vadd.f32 %v444_v63, %v435_v4  ;;  %v454_v48 = vsel %vm281_vm5, %v450_v12, %v452_v57 }
 0x31a   :  { %v721_v2 = vpop.permute.xlu1 %720  ;;  %v547_v58 = vpop.permute.xlu0 %546  ;;  %v413_v11 = vadd.f32 %v1765_v43, %v397_v10  ;;  %v265_v1 = vrot.slane %v249_v16, 4  ;;  %v267_v45 = vrot.slane %v250_v17, 4  ;;  %v287_v56 = vadd.f32 %v284_v15, %v274_v55 }
 0x31b   :  { %v257_v26 = vsel %vm255_vm3, %v252_v0, %v254_v25  ;;  %v259_v14 = vsel %vm255_vm3, %v254_v25, %v252_v0  ;;  %v2075_v52 = vmul.f32 0.020408163, %v286_v20  ;;  %v280_v43 = vrot.slane %v2029_v6, 6 }
 0x31c   :  { %v262_v27 = vadd.f32 %v257_v26, %v249_v16  ;;  %v263_v18 = vadd.f32 %v259_v14, %v250_v17  ;;  %v415_v7 = vrot.slane %v2060_v13, 1  ;;  %v417_v23 = vrot.slane %v413_v11, 1 }
 0x31d   :  { %v458_v10 = vadd.f32 %v454_v48, %v446_v49  ;;  %v459_v59 = vadd.f32 %v456_v60, %v447_v5  ;;  %v554_v63 = vadd.f32 %v543_v53, %v1714_v62  ;;  %v555_v15 = vadd.f32 %v545_v34, %v1719_v19 }
 0x31e   :  { %v549_v32 = vpop.permute.xlu1 %548  ;;  %v559_v4 = vpop.permute.xlu0 %558  ;;  %v270_v12 = vsel %vm268_vm4, %v265_v1, %v267_v45  ;;  %v272_v57 = vsel %vm268_vm4, %v267_v45, %v265_v1  ;;  %v419_v16 = vsel %vm242_vm2, %v415_v7, %v417_v23  ;;  %v421_v6 = vsel %vm242_vm2, %v417_v23, %v415_v7 }
 0x31f   :  { %v275_v17 = vadd.f32 %v270_v12, %v262_v27  ;;  %v276_v55 = vadd.f32 %v272_v57, %v263_v18  ;;  %v424_v20 = vadd.f32 %v419_v16, %v2060_v13  ;;  %v425_v0 = vadd.f32 %v421_v6, %v413_v11 }
 0x320   :  { %v2090_v19 = vmul.f32 0.020408163, %v287_v56  ;;  %v453_v34 = vrot.slane %v413_v11, 6  ;;  %v570_v25 = vadd.f32 %v559_v4, %v554_v63  ;;  %v283_v5 = vsel %vm281_vm5, %v278_v47, %v280_v43 }
 0x321   :  { %v285_v48 = vsel %vm281_vm5, %v280_v43, %v278_v47  ;;  %v427_v26 = vrot.slane %v424_v20, 2  ;;  %v429_v14 = vrot.slane %v425_v0, 2  ;;  %v2096_v1 = vmul.f32 0.020408163, %v458_v10 }
 0x322   :  { %v561_v62 = vpop.permute.xlu1 %560  ;;  %v723_v53 = vpop.permute.xlu0 %722  ;;  %v451_v45 = vrot.slane %v2060_v13, 6  ;;  %v2100_v60 = vadd.f32 %v1789_v44, %v570_v25  ;;  %v2105_v11 = vmul.f32 0.020408163, %v459_v59  ;;  %v288_v27 = vadd.f32 %v283_v5, %v275_v17 }
 0x323   :  { %v571_v49 = vadd.f32 %v561_v62, %v555_v15  ;;  %v289_v18 = vadd.f32 %v285_v48, %v276_v55  ;;  %v730_v4 = vadd.f32 %v2046_v61, %v1722_v33  ;;  %v439_v7 = vrot.slane %v424_v20, 4 }
 0x324   :  { %v455_v23 = vsel %vm281_vm5, %v451_v45, %v453_v34  ;;  %v731_v13 = vadd.f32 %v721_v2, %v1729_v35  ;;  %v556_v44 = vadd.f32 %v547_v58, %v1732_v36  ;;  %v441_v10 = vrot.slane %v425_v0, 4 }
 0x325   :  { %v2103_v56 = vadd.f32 %v1791_v29, %v571_v49  ;;  %v431_v29 = vsel %vm255_vm3, %v427_v26, %v429_v14  ;;  %v590_v59 = vrot.slane %v2100_v60, 1  ;;  %v433_v33 = vsel %vm255_vm3, %v429_v14, %v427_v26 }
 0x326   :  { %v725_v47 = vpop.permute.xlu1 %724  ;;  %v735_v43 = vpop.permute.xlu0 %734  ;;  %v457_v61 = vsel %vm281_vm5, %v453_v34, %v451_v45  ;;  %v557_v15 = vadd.f32 %v549_v32, %v1739_v38  ;;  %v2124_v35 = vmul.f32 %v2075_v52, %v2075_v52  ;;  %v2126_v36 = vmul.f32 0.020408163, %v288_v27 }
 0x327   :  { %v592_v63 = vrot.slane %v2103_v56, 1  ;;  %v2128_v2 = vmul.f32 0.020408163, %v289_v18  ;;  %v436_v6 = vadd.f32 %v431_v29, %v424_v20  ;;  %v2138_v32 = vmul.f32 %v2090_v19, %v2090_v19 }
 0x328   :  { %v437_v55 = vadd.f32 %v433_v33, %v425_v0  ;;  %v443_v62 = vsel %vm268_vm4, %v439_v7, %v441_v10  ;;  %v746_v34 = vadd.f32 %v735_v43, %v730_v4  ;;  %v445_v49 = vsel %vm268_vm4, %v441_v10, %v439_v7 }
 0x329   :  { %v594_v58 = vsel %vm242_vm2, %v590_v59, %v592_v63  ;;  %v596_v12 = vsel %vm242_vm2, %v592_v63, %v590_v59  ;;  %v626_v5 = vrot.slane %v2100_v60, 6  ;;  %v448_v0 = vadd.f32 %v443_v62, %v436_v6 }
 0x32a   :  { %v737_v57 = vpop.permute.xlu1 %736  ;;  %v563_v16 = vpop.permute.xlu0 %562  ;;  %v598_v17 = vadd.f32 %v594_v58, %v2100_v60  ;;  %v599_v38 = vadd.f32 %v596_v12, %v2103_v56  ;;  %v762_v45 = vadd.f32 %v1793_v51, %v746_v34  ;;  %v628_v43 = vrot.slane %v2103_v56, 6 }
 0x32b   :  { %v747_v25 = vadd.f32 %v737_v57, %v731_v13  ;;  %v449_v7 = vadd.f32 %v445_v49, %v437_v55  ;;  %v732_v10 = vadd.f32 %v723_v53, %v1742_v40  ;;  %v572_v57 = vadd.f32 %v563_v16, %v556_v44 }
 0x32c   :  { %v602_v20 = vrot.slane %v598_v17, 2  ;;  %v604_v48 = vrot.slane %v599_v38, 2  ;;  %v614_v26 = vrot.slane %v598_v17, 4  ;;  %v616_v14 = vrot.slane %v599_v38, 4 }
 0x32d   :  { %v763_v27 = vadd.f32 %v1795_v30, %v747_v25  ;;  %v766_v63 = vrot.slane %v762_v45, 1  ;;  %v460_v56 = vadd.f32 %v455_v23, %v448_v0  ;;  %v632_v55 = vsel %vm281_vm5, %v628_v43, %v626_v5 }
 0x32e   :  { %v565_v18 = vpop.permute.xlu1 %564  ;;  %v606_v29 = vsel %vm255_vm3, %v602_v20, %v604_v48  ;;  %v608_v4 = vsel %vm255_vm3, %v604_v48, %v602_v20  ;;  %v739_v59 = vpop.permute.xlu0 %738  ;;  %v618_v51 = vsel %vm268_vm4, %v614_v26, %v616_v14  ;;  %v620_v30 = vsel %vm268_vm4, %v616_v14, %v614_v26 }
 0x32f   :  { %v610_v60 = vadd.f32 %v606_v29, %v598_v17  ;;  %v611_v13 = vadd.f32 %v608_v4, %v599_v38  ;;  %v768_v33 = vrot.slane %v763_v27, 1  ;;  %v573_v6 = vadd.f32 %v565_v18, %v557_v15 }
 0x330   :  { %v733_v17 = vadd.f32 %v725_v47, %v1751_v41  ;;  %v630_v38 = vsel %vm281_vm5, %v626_v5, %v628_v43  ;;  %v461_v44 = vadd.f32 %v457_v61, %v449_v7  ;;  %v2168_v41 = vmul.f32 %v2096_v1, %v2096_v1 }
 0x331   :  { %v622_v58 = vadd.f32 %v618_v51, %v610_v60  ;;  %v623_v12 = vadd.f32 %v620_v30, %v611_v13  ;;  %v770_v40 = vsel %vm242_vm2, %v766_v63, %v768_v33  ;;  %v772_v53 = vsel %vm242_vm2, %v768_v33, %v766_v63 }
 0x332   :  { %v741_v62 = vpop.permute.xlu1 %740  ;;  %v774_v34 = vadd.f32 %v770_v40, %v762_v45  ;;  %v775_v25 = vadd.f32 %v772_v53, %v763_v27  ;;  %v2171_v49 = vadd.f32 %v1797_v54, %v572_v57  ;;  %v2174_v20 = vadd.f32 %v1799_v3, %v573_v6  ;;  %v2176_v48 = vpop.permute.xlu0 %894 }
 0x333   :  { %v634_v15 = vadd.f32 %v630_v38, %v622_v58  ;;  %v635_v16 = vadd.f32 %v632_v55, %v623_v12  ;;  %v2180_v26 = vmul.f32 0.020408163, %v460_v56  ;;  %v2184_v18 = vmul.f32 %v2105_v11, %v2105_v11 }
 0x334   :  { %v778_v47 = vrot.slane %v774_v34, 2  ;;  %v780_v23 = vrot.slane %v775_v25, 2  ;;  %v790_v61 = vrot.slane %v774_v34, 4  ;;  %v792_v14 = vrot.slane %v775_v25, 4 }
 0x335   :  { %v802_v0 = vrot.slane %v762_v45, 6  ;;  %v804_v29 = vrot.slane %v763_v27, 6  ;;  %v638_v4 = vmul.f32 0.020408163, %v634_v15  ;;  %v639_v43 = vmul.f32 0.020408163, %v635_v16 }
 0x336   :  { %v2178_v5 = vpop.permute.xlu1 %896  ;;  %v782_v54 = vsel %vm255_vm3, %v778_v47, %v780_v23  ;;  %v784_v3 = vsel %vm255_vm3, %v780_v23, %v778_v47  ;;  %v794_v13 = vsel %vm268_vm4, %v790_v61, %v792_v14  ;;  %v796_v51 = vsel %vm268_vm4, %v792_v14, %v790_v61  ;;  %v2204_v40 = vpop.permute.xlu0 %898 }
 0x337   :  { %v786_v7 = vadd.f32 %v782_v54, %v774_v34  ;;  %v787_v60 = vadd.f32 %v784_v3, %v775_v25  ;;  %v591_v30 = vrot.slane %v2171_v49, 1  ;;  %v593_v45 = vrot.slane %v2174_v20, 1 }
 0x338   :  { %v748_v58 = vadd.f32 %v739_v59, %v732_v10  ;;  %v749_v12 = vadd.f32 %v741_v62, %v733_v17  ;;  %v806_v27 = vsel %vm281_vm5, %v802_v0, %v804_v29  ;;  %v808_v57 = vsel %vm281_vm5, %v804_v29, %v802_v0 }
 0x339   :  { %v798_v63 = vadd.f32 %v794_v13, %v786_v7  ;;  %v799_v33 = vadd.f32 %v796_v51, %v787_v60  ;;  %v595_v6 = vsel %vm242_vm2, %v591_v30, %v593_v45  ;;  %v597_v56 = vsel %vm242_vm2, %v593_v45, %v591_v30 }
 0x33a   :  { %v2206_v53 = vpop.permute.xlu1 %900  ;;  %v600_v10 = vadd.f32 %v595_v6, %v2171_v49  ;;  %v601_v59 = vadd.f32 %v597_v56, %v2174_v20  ;;  %v2210_v62 = vmul.f32 0.020408163, %v461_v44  ;;  %v998_v17 = vsub.f32 %v638_v4, %v2124_v35 }
 0x33b   :  { %v810_v38 = vadd.f32 %v806_v27, %v798_v63  ;;  %v811_v55 = vadd.f32 %v808_v57, %v799_v33  ;;  %v999_v34 = vsub.f32 %v639_v43, %v2138_v32  ;;  %v2216_v25 = vadd.f32 %v2168_v41, %v2124_v35 }
 0x33c   :  { %v603_v15 = vrot.slane %v600_v10, 2  ;;  %v605_v16 = vrot.slane %v601_v59, 2  ;;  %v764_v47 = vadd.f32 %v1846_v28, %v748_v58  ;;  %v765_v23 = vadd.f32 %v1851_v31, %v749_v12 }
 0x33d   :  { %v814_v61 = vmul.f32 0.020408163, %v810_v38  ;;  %v815_v14 = vmul.f32 0.020408163, %v811_v55  ;;  %v615_v0 = vrot.slane %v600_v10, 4  ;;  %v617_v54 = vrot.slane %v601_v59, 4 }
 0x33e   :  { %v2222_v44 = vadd.f32 %v2184_v18, %v2138_v32  ;;  %v607_v3 = vsel %vm255_vm3, %v603_v15, %v605_v16  ;;  %v609_v35 = vsel %vm255_vm3, %v605_v16, %v603_v15  ;;  %v2230_v29 = vmul.f32 %v2126_v36, %v2126_v36  ;;  %v911_v32 = vpop.permute.xlu0 %910  ;;  %v913_v7 = vpop.permute.xlu1 %912 }
 0x33f   :  { %v612_v28 = vadd.f32 %v607_v3, %v600_v10  ;;  %v613_v31 = vadd.f32 %v609_v35, %v601_v59  ;;  %v629_v4 = vrot.slane %v2174_v20, 6  ;;  %v2235_v43 = vmul.f32 %v2128_v2, %v2128_v2 }
 0x340   :  { %v2237_v60 = vmul.f32 1.0208334, %v998_v17  ;;  %v627_v13 = vrot.slane %v2171_v49, 6  ;;  %v767_v51 = vrot.slane %v764_v47, 1  ;;  %v769_v30 = vrot.slane %v765_v23, 1 }
 0x341   :  { %v1003_v45 = vmul.f32 1.0208334, %v999_v34  ;;  %v1010_v63 = vsub.f32 %v814_v61, %v2168_v41  ;;  %v1011_v33 = vsub.f32 %v815_v14, %v2184_v18  ;;  %v619_v20 = vsel %vm268_vm4, %v615_v0, %v617_v54 }
 0x342   :  { %v621_v58 = vsel %vm268_vm4, %v617_v54, %v615_v0  ;;  %v624_v12 = vadd.f32 %v619_v20, %v612_v28  ;;  %v771_v27 = vsel %vm242_vm2, %v767_v51, %v769_v30  ;;  %v773_v49 = vsel %vm242_vm2, %v769_v30, %v767_v51  ;;  %v915_v16 = vpop.permute.xlu0 %914  ;;  %v917_v61 = vpop.permute.xlu1 %916 }
 0x343   :  { %v625_v57 = vadd.f32 %v621_v58, %v613_v31  ;;  %v631_v6 = vsel %vm281_vm5, %v627_v13, %v629_v4  ;;  %v776_v41 = vadd.f32 %v771_v27, %v764_v47  ;;  %v777_v56 = vadd.f32 %v773_v49, %v765_v23 }
 0x344   :  { %v633_v18 = vsel %vm281_vm5, %v629_v4, %v627_v13  ;;  %v803_v38 = vrot.slane %v764_v47, 6  ;;  %v805_v55 = vrot.slane %v765_v23, 6  ;;  %v2256_v10 = vmul.f32 %v2180_v26, %v2180_v26 }
 0x345   :  { %v1014_v59 = vmul.f32 1.0208334, %v1010_v63  ;;  %v1015_v17 = vmul.f32 1.0208334, %v1011_v33  ;;  %v779_v34 = vrot.slane %v776_v41, 2  ;;  %v781_v15 = vrot.slane %v777_v56, 2 }
 0x346   :  { %v636_v14 = vadd.f32 %v631_v6, %v624_v12  ;;  %v791_v0 = vrot.slane %v776_v41, 4  ;;  %v793_v54 = vrot.slane %v777_v56, 4  ;;  %v906_v3 = vadd.f32 %v2176_v48, %v1768_v46  ;;  %v933_v6 = vpop.permute.xlu1 %932 }
 0x347   :  { %v637_v35 = vadd.f32 %v633_v18, %v625_v57  ;;  %v783_v47 = vsel %vm255_vm3, %v779_v34, %v781_v15  ;;  %v785_v23 = vsel %vm255_vm3, %v781_v15, %v779_v34  ;;  %v907_v28 = vadd.f32 %v2178_v5, %v1775_v50  ;;  %v931_v57 = vpop.permute.xlu0 %930 }
 0x348   :  { %v788_v31 = vadd.f32 %v783_v47, %v776_v41  ;;  %v789_v4 = vadd.f32 %v785_v23, %v777_v56  ;;  %v807_v13 = vsel %vm281_vm5, %v803_v38, %v805_v55  ;;  %v809_v51 = vsel %vm281_vm5, %v805_v55, %v803_v38 }
 0x349   :  { %v795_v46 = vsel %vm268_vm4, %v791_v0, %v793_v54  ;;  %v797_v48 = vsel %vm268_vm4, %v793_v54, %v791_v0  ;;  %v922_v30 = vadd.f32 %v911_v32, %v906_v3  ;;  %v923_v63 = vadd.f32 %v913_v7, %v907_v28 }
 0x34a   :  { %v800_v33 = vadd.f32 %v795_v46, %v788_v31  ;;  %v801_v20 = vadd.f32 %v797_v48, %v789_v4  ;;  %v908_v50 = vadd.f32 %v2204_v40, %v1778_v39  ;;  %v909_v5 = vadd.f32 %v2206_v53, %v1785_v42 }
 0x34b   :  { %v640_v58 = vmul.f32 0.020408163, %v636_v14  ;;  %v641_v12 = vmul.f32 0.020408163, %v637_v35  ;;  %v938_v27 = vadd.f32 %v1853_v8, %v922_v30  ;;  %v939_v49 = vadd.f32 %v1855_v9, %v923_v63 }
 0x34c   :  { %v812_v41 = vadd.f32 %v807_v13, %v800_v33  ;;  %v813_v56 = vadd.f32 %v809_v51, %v801_v20  ;;  %v924_v32 = vadd.f32 %v915_v16, %v908_v50  ;;  %v925_v7 = vadd.f32 %v917_v61, %v909_v5 }
 0x34d   :  { %v2282_v18 = vmul.f32 %v2210_v62, %v2210_v62  ;;  %v2286_v39 = vadd.f32 %v2256_v10, %v2230_v29  ;;  %v942_v42 = vrot.slane %v938_v27, 1  ;;  %v944_v40 = vrot.slane %v939_v49, 1 }
 0x34e   :  { %v816_v53 = vmul.f32 0.020408163, %v812_v41  ;;  %v817_v8 = vmul.f32 0.020408163, %v813_v56  ;;  %v2288_v38 = vadd.f32 %v931_v57, %v924_v32  ;;  %v2290_v9 = vadd.f32 %v933_v6, %v925_v7 }
 0x34f   :  { %v1064_v55 = vadd.f32 %v1014_v59, %v2237_v60  ;;  %v2293_v34 = vadd.f32 %v1015_v17, %v1003_v45  ;;  %v946_v15 = vsel %vm242_vm2, %v942_v42, %v944_v40  ;;  %v948_v16 = vsel %vm242_vm2, %v944_v40, %v942_v42 }
 0x350   :  { %v1000_v61 = vsub.f32 %v640_v58, %v2230_v29  ;;  %v1001_v14 = vsub.f32 %v641_v12, %v2235_v43  ;;  %v950_v0 = vadd.f32 %v946_v15, %v938_v27  ;;  %v951_v54 = vadd.f32 %v948_v16, %v939_v49 }
 0x351   :  { %v978_v3 = vrot.slane %v938_v27, 6  ;;  %v980_v35 = vrot.slane %v939_v49, 6  ;;  %v943_v47 = vrot.slane %v2288_v38, 1  ;;  %v945_v60 = vrot.slane %v2290_v9, 1 }
 0x352   :  { %v1012_v45 = vsub.f32 %v816_v53, %v2256_v10  ;;  %v1013_v59 = vsub.f32 %v817_v8, %v2282_v18  ;;  %v954_v17 = vrot.slane %v950_v0, 2  ;;  %v956_v23 = vrot.slane %v951_v54, 2 }
 0x353   :  { %v966_v28 = vrot.slane %v950_v0, 4  ;;  %v968_v31 = vrot.slane %v951_v54, 4  ;;  %v947_v29 = vsel %vm242_vm2, %v943_v47, %v945_v60  ;;  %v949_v4 = vsel %vm242_vm2, %v945_v60, %v943_v47 }
 0x354   :  { %v1068_v13 = vadd.f32 %v1064_v55, %v2010_v21  ;;  %v1004_v51 = vmul.f32 1.0208334, %v1000_v61  ;;  %v958_v46 = vsel %vm255_vm3, %v954_v17, %v956_v23  ;;  %v960_v10 = vsel %vm255_vm3, %v956_v23, %v954_v17 }
 0x355   :  { %v1005_v48 = vmul.f32 1.0208334, %v1001_v14  ;;  %v962_v30 = vadd.f32 %v958_v46, %v950_v0  ;;  %v963_v63 = vadd.f32 %v960_v10, %v951_v54  ;;  %v982_v33 = vsel %vm281_vm5, %v978_v3, %v980_v35 }
 0x356   :  { %v970_v20 = vsel %vm268_vm4, %v966_v28, %v968_v31  ;;  %v972_v50 = vsel %vm268_vm4, %v968_v31, %v966_v28  ;;  %v952_v5 = vadd.f32 %v947_v29, %v2288_v38  ;;  %v953_v58 = vadd.f32 %v949_v4, %v2290_v9 }
 0x357   :  { %v1016_v12 = vmul.f32 1.0208334, %v1012_v45  ;;  %v1017_v27 = vmul.f32 1.0208334, %v1013_v59  ;;  %v974_v49 = vadd.f32 %v970_v20, %v962_v30  ;;  %v975_v57 = vadd.f32 %v972_v50, %v963_v63 }
 0x358   :  { %v955_v6 = vrot.slane %v952_v5, 2  ;;  %v957_v41 = vrot.slane %v953_v58, 2  ;;  %v967_v56 = vrot.slane %v952_v5, 4  ;;  %v969_v32 = vrot.slane %v953_v58, 4 }
 0x359   :  { %v984_v7 = vsel %vm281_vm5, %v980_v35, %v978_v3  ;;  %v986_v42 = vadd.f32 %v982_v33, %v974_v49  ;;  %v1018_v40 = vmul.f32 %v2096_v1, %v2075_v52  ;;  %v1019_v53 = vmul.f32 %v2105_v11, %v2090_v19 }
 0x35a   :  { %v987_v8 = vadd.f32 %v984_v7, %v975_v57  ;;  %v959_v55 = vsel %vm255_vm3, %v955_v6, %v957_v41  ;;  %v961_v15 = vsel %vm255_vm3, %v957_v41, %v955_v6  ;;  %v981_v16 = vrot.slane %v2290_v9, 6 }
 0x35b   :  { %v979_v61 = vrot.slane %v2288_v38, 6  ;;  %v964_v14 = vadd.f32 %v959_v55, %v952_v5  ;;  %v965_v0 = vadd.f32 %v961_v15, %v953_v58  ;;  %v1020_v54 = vmul.f32 %v2180_v26, %v2126_v36 }
 0x35c   :  { %v1066_v3 = vadd.f32 %v1016_v12, %v1004_v51  ;;  %v1067_v35 = vadd.f32 %v1017_v27, %v1005_v48  ;;  %v971_v47 = vsel %vm268_vm4, %v967_v56, %v969_v32  ;;  %v973_v60 = vsel %vm268_vm4, %v969_v32, %v967_v56 }
 0x35d   :  { %v990_v45 = vmul.f32 0.020408163, %v986_v42  ;;  %v976_v59 = vadd.f32 %v971_v47, %v964_v14  ;;  %v977_v17 = vadd.f32 %v973_v60, %v965_v0  ;;  %v1021_v9 = vmul.f32 %v2210_v62, %v2128_v2 }
 0x35e   :  { %v991_v38 = vmul.f32 0.020408163, %v987_v8  ;;  %v983_v23 = vsel %vm281_vm5, %v979_v61, %v981_v16  ;;  %v985_v28 = vsel %vm281_vm5, %v981_v16, %v979_v61  ;;  %v1059_v31 = vadd.f32 %v2282_v18, %v2235_v43 }
 0x35f   :  { %v988_v29 = vadd.f32 %v983_v23, %v976_v59  ;;  %v989_v4 = vadd.f32 %v985_v28, %v977_v17  ;;  %v1060_v51 = vadd.f32 %v2216_v25, %v2031_v24  ;;  %v1061_v46 = vadd.f32 %v2222_v44, %v2031_v24 }
 0x360   :  { %v1062_v10 = vadd.f32 %v2286_v39, %v2031_v24  ;;  %v1069_v48 = vadd.f32 %v2293_v34, %v2010_v21  ;;  %v1070_v30 = vadd.f32 %v1066_v3, %v2010_v21  ;;  %v1071_v63 = vadd.f32 %v1067_v35, %v2010_v21 }
 0x361   :  { %v1022_v33 = vsub.f32 %v990_v45, %v1018_v40  ;;  %v992_v43 = vmul.f32 0.020408163, %v988_v29  ;;  %v993_v18 = vmul.f32 0.020408163, %v989_v4  ;;  %v1063_v20 = vadd.f32 %v1059_v31, %v2031_v24 }
 0x362   :  { %v1023_v50 = vsub.f32 %v991_v38, %v1019_v53  ;;  %v1072_v25 = vmul.f32 %v1068_v13, %v1060_v51  ;;  %v1073_v5 = vmul.f32 %v1069_v48, %v1061_v46  ;;  %v1074_v58 = vmul.f32 %v1070_v30, %v1062_v10 }
 0x363   :  { %v1024_v44 = vsub.f32 %v992_v43, %v1020_v54  ;;  %v1075_v12 = vmul.f32 %v1071_v63, %v1063_v20  ;;  %v1025_v27 = vsub.f32 %v993_v18, %v1021_v9  ;;  %v1026_v39 = vmul.f32 1.0208334, %v1022_v33 }
 0x364   :  { %1173 = vrcp.f32 %v1072_v25  ;;  %v1027_v34 = vmul.f32 1.0208334, %v1023_v50  ;;  %v1034_v6 = vmul.f32 2.0, %v2075_v52  ;;  %v1035_v56 = vmul.f32 2.0, %v2090_v19 }
 0x365   :  { %1175 = vrcp.f32 %v1073_v5  ;;  %v1028_v49 = vmul.f32 1.0208334, %v1024_v44  ;;  %v1029_v57 = vmul.f32 1.0208334, %v1025_v27  ;;  %v1047_v41 = vmul.f32 2.0, %v1026_v39 }
 0x366   :  { %1177 = vrcp.f32 %v1074_v58  ;;  %v1048_v32 = vmul.f32 2.0, %v1027_v34  ;;  %v1038_v13 = vmul.f32 %v1034_v6, %v2096_v1  ;;  %v1036_v7 = vmul.f32 2.0, %v2126_v36 }
 0x367   :  { %1179 = vrcp.f32 %v1075_v12  ;;  %v1049_v42 = vmul.f32 2.0, %v1028_v49  ;;  %v1100_v40 = vadd.s32 8, %v1972_v22  ;;  %v1037_v53 = vmul.f32 2.0, %v2128_v2 }
 0x368   :  { %v1039_v8 = vmul.f32 %v1035_v56, %v2105_v11  ;;  %v1050_v55 = vmul.f32 2.0, %v1029_v57  ;;  %v1102_v15 = vand.u32 127, %v240_v37  ;;  %v1040_v52 = vmul.f32 %v1036_v7, %v2180_v26 }
 0x369   :  { %v1052_v16 = vadd.f32 %v2010_v21, %v1047_v41  ;;  %v1041_v61 = vmul.f32 %v1037_v53, %v2210_v62  ;;  %v1053_v1 = vadd.f32 %v2010_v21, %v1048_v32  ;;  %v1043_v14 = vadd.f32 %v2031_v24, %v1038_v13 }
 0x36a   :  { %v1054_v22 = vadd.f32 %v2010_v21, %v1049_v42  ;;  %vm1104_vm6 = vcmp.lt.s32.totalorder %v1100_v40, 10  ;;  %v1044_v0 = vadd.f32 %v2031_v24, %v1039_v8  ;;  %v1055_v37 = vadd.f32 %v2010_v21, %v1050_v55 }
 0x36b   :  { %vm1105_vm7 = vcmp.lt.s32.totalorder %v1102_v15, 10  ;;  %v1045_v3 = vadd.f32 %v2031_v24, %v1040_v52  ;;  %v1092_v47 = vmul.f32 %v1052_v16, %v1043_v14  ;;  %v1046_v60 = vadd.f32 %v2031_v24, %v1041_v61 }
 0x36c   :  { %v1093_v17 = vmul.f32 %v1053_v1, %v1044_v0  ;;  %vm1107_vm8 = vmand %vm1104_vm6, %vm1105_vm7 }
 0x36d   :  { %v1094_v23 = vmul.f32 %v1054_v22, %v1045_v3  ;;  %v1095_v29 = vmul.f32 %v1055_v37, %v1046_v60 }
 0x36e   :  { %v1174_v19 = vpop.eup %1173 }
 0x36f   :  { %v1176_v36 = vpop.eup %1175  ;;  %v1080_v2 = vmul.f32 %v1174_v19, %v1072_v25 }
 0x370   :  { %v1178_v11 = vpop.eup %1177  ;;  %v1081_v26 = vmul.f32 %v1176_v36, %v1073_v5 }
 0x371   :  { %v1180_v54 = vpop.eup %1179  ;;  %v1082_v62 = vmul.f32 %v1178_v11, %v1074_v58  ;;  %v1084_v35 = vsub.f32 2.0, %v1080_v2 }
 0x372   :  { %v1083_v45 = vmul.f32 %v1180_v54, %v1075_v12  ;;  %v1085_v59 = vsub.f32 2.0, %v1081_v26 }
 0x373   :  { %v1086_v9 = vsub.f32 2.0, %v1082_v62  ;;  %v1088_v38 = vmul.f32 %v1174_v19, %v1084_v35 }
 0x374   :  { %v1087_v28 = vsub.f32 2.0, %v1083_v45  ;;  %v1089_v31 = vmul.f32 %v1176_v36, %v1085_v59 }
 0x375   :  { %v1090_v21 = vmul.f32 %v1178_v11, %v1086_v9  ;;  %v1096_v4 = vmul.f32 %v1092_v47, %v1088_v38 }
 0x376   :  { %v1091_v51 = vmul.f32 %v1180_v54, %v1087_v28  ;;  %v1097_v46 = vmul.f32 %v1093_v17, %v1089_v31 }
 0x377   :  { %v1098_v10 = vmul.f32 %v1094_v23, %v1090_v21  ;;  %v1108_v48 = vsel %vm1105_vm7, %v1096_v4, 0.0 }
 0x378   :  { %v1099_v24 = vmul.f32 %v1095_v29, %v1091_v51  ;;  %v1109_v30 = vsel %vm1107_vm8, %v1097_v46, 0.0  ;;  %v1112_v63 = vsel %vm88_vm1, %v1108_v48, 0.0 }
 0x379   :  { %v1110_v33 = vsel %vm1105_vm7, %v1098_v10, 0.0  ;;  %v1113_v43 = vsel %vm88_vm1, %v1109_v30, 0.0 }
 0x37a   :  { %v1111_v18 = vsel %vm1107_vm8, %v1099_v24, 0.0  ;;  %v1114_v20 = vadd.f32 %v1113_v43, %v1112_v63  ;;  %v1115_v50 = vsel %vm88_vm1, %v1110_v33, 0.0 }
 0x37b   :  { %v1117_v5 = vsel %vm88_vm1, %v1111_v18, 0.0 }
 0x37c   :  { %v1116_v25 = vadd.f32 %v1115_v50, %v1114_v20  ;;  %v97_v44 = vpop.xlane.xlu0 %96 }
 0x37d   :  { %v98_v12 = vrot.slane %v97_v44, 4 }
 0x37e   :  { %v1118_v58 = vadd.f32 %v1117_v5, %v1116_v25 }
 0x37f   :  { %v99_v27 = vadd.f32 %v98_v12, %v97_v44 }
 0x380   :  { %1119 = vadd.xlane.f32.xlu1 %v1118_v58 }
 0x381   :  { %v100_v39 = vrot.slane %v99_v27, 2 }
 0x383   :  { %v101_v34 = vadd.f32 %v100_v39, %v99_v27 }
 0x385   :  { %v102_v49 = vrot.slane %v101_v34, 1 }
 0x387   :  { %v103_v57 = vadd.f32 %v102_v49, %v101_v34 }
 0x389   :  { %1157 = vpush %v103_v57 }
 0x3ba   :  { %s1158_s15 = spop %1157 }
 0x3bb   :  { %106 = sst [smem:[#allocation9]] %s1158_s15 }
 0x3bc   :  { %1256 = shalt.err (!%p1253_p12)
}
 0x3bd   :  { %s1285_s23 = smov [#allocation9]   ;;  %s1257_s0 = scalar_lea.hbm %s2414_s5, 16 }
 0x3be   :  { %1137 = dma.smem_to_hbm %s1285_s23, 16, %s2413_s4, [#allocation5]  }
 0x3bf   :  { %p1258_p13 = scmp.ne.s32.totalorder %s2414_s5, %s1257_s0  ;;  %p1261_p0 = scmp.lt.u32.totalorder %s1257_s0, %s2414_s5 }
 0x3c1   :  { %p1263_p1 = pnand %p1261_p0, %p1258_p13 }
 0x40d   :  { %v1120_v6 = vpop.xlane.xlu1 %1119 }
 0x40e   :  { %v1121_v41 = vrot.slane %v1120_v6, 4 }
 0x410   :  { %v1122_v56 = vadd.f32 %v1121_v41, %v1120_v6 }
 0x412   :  { %v1123_v32 = vrot.slane %v1122_v56, 2 }
 0x414   :  { %v1124_v13 = vadd.f32 %v1123_v32, %v1122_v56 }
 0x416   :  { %v1125_v7 = vrot.slane %v1124_v13, 1 }
 0x418   :  { %v1126_v42 = vadd.f32 %v1125_v7, %v1124_v13 }
 0x41a   :  { %1159 = vpush %v1126_v42 }
 0x44b   :  { %s1160_s26 = spop %1159 }
 0x44c   :  { %1129 = sst [smem:[#allocation10]] %s1160_s26 }
 0x44d   :  { %1266 = shalt.err (!%p1263_p1)
}
 0x44e   :  { %s1286_s30 = smov [#allocation10]  }
 0x44f   :  { %1145 = dma.smem_to_hbm %s1286_s30, 16, %s2414_s5, [#allocation11]  }
 0x450   :  { %1271 = dma.done.wait [#allocation5], 16  }
 0x451   :  { %1272 = vsyncadd [#allocation5], 4294967280 }
 0x452   :  { %1273 = dma.done.wait [#allocation11], 16  }
 0x453   :  { %1274 = vsyncadd [#allocation11], 4294967280 }
 0x454   :  { %1152 = sfence }
 0x455   :  { %1153 = vsyncpa [#allocation4], 1 }
 0x456   :  { %1154 = vsyncpa [#allocation7], 1 }
 0x457   :  { %1155 = vsyncpa [#allocation5], 1 }
 0x458   :  { %1156 = vsyncpa [#allocation11], 1 }

</bundles_post_ra>
